<compile_context>
chip_gen: v5e
topology: v5e:2x2
jax: 0.10.0
libtpu: 0.0.40
codegen_flags: <defaults>
</compile_context>

<pallas_src>
import jax
import jax.numpy as jnp
from jax import lax
from jax.experimental import pallas as pl
from jax.experimental.pallas import tpu as pltpu

# Model hyper-parameters (small, consistent with the module's __init__).
WINDOW_SIZE = 16
WINDOW_COUNT = 8
H_DIM = 32
Z_DIM = 8
L_H_DIM = 32
BATCH = 2


# ----------------------------------------------------------------------------
# Fused kernel: encoder -> reparameterize -> decoder -> LSTM -> fc
# ----------------------------------------------------------------------------
def _seqvl_kernel(x_ref, eps_ref,
                  we1_ref, be1_ref, wmulv_ref, bmulv_ref,
                  wd1_ref, bd1_ref, wd2_ref, bd2_ref,
                  wih_ref, whh_ref, b_ref, wfc_ref, bfc_ref,
                  xhat_ref, mulv_ref, y_ref,
                  h_scratch):
    Z = eps_ref.shape[1]
    LH = whh_ref.shape[0]
    B, T, _ = h_scratch.shape

    # ---------------- VAE: all B*T rows in one shot ----------------
    x = x_ref[...]                                                    # [N, W]
    h1 = jnp.maximum(
        jnp.dot(x, we1_ref[...], preferred_element_type=jnp.float32)
        + be1_ref[...], 0.0)                                          # [N, H]
    mulv = (jnp.dot(h1, wmulv_ref[...], preferred_element_type=jnp.float32)
            + bmulv_ref[...])                                         # [N, 2Z] = mu | logvar
    mulv_ref[...] = mulv
    mu = mulv[:, :Z]
    logvar = mulv[:, Z:]
    z = mu + jnp.exp(0.5 * logvar) * eps_ref[...]                     # reparameterize
    h2 = jnp.maximum(
        jnp.dot(z, wd1_ref[...], preferred_element_type=jnp.float32)
        + bd1_ref[...], 0.0)                                          # [N, H]
    x_hat = (jnp.dot(h2, wd2_ref[...], preferred_element_type=jnp.float32)
             + bd2_ref[...])                                          # [N, W]
    xhat_ref[...] = x_hat

    # ---------------- LSTM: hoisted input projection ----------------
    # xg[n] = x_hat[n] @ W_ih^T + (b_ih + b_hh), flat index n = b*T + t.
    xg = (jnp.dot(x_hat, wih_ref[...], preferred_element_type=jnp.float32)
          + b_ref[...])                                               # [N, 4LH]
    xg = xg.reshape(B, T, 4 * LH)
    whh = whh_ref[...]

    h = jnp.zeros((B, LH), jnp.float32)
    c = jnp.zeros((B, LH), jnp.float32)
    # Static unroll (T is small and fixed); PyTorch gate order (i, f, g, o).
    for t in range(T):
        gates = xg[:, t, :] + jnp.dot(h, whh,
                                      preferred_element_type=jnp.float32)  # [B, 4LH]
        sa = jax.nn.sigmoid(gates)      # one full-width EUP pass (i, f, o)
        ta = jnp.tanh(gates)            # one full-width EUP pass (g)
        i_g = sa[:, 0 * LH:1 * LH]
        f_g = sa[:, 1 * LH:2 * LH]
        g_g = ta[:, 2 * LH:3 * LH]
        o_g = sa[:, 3 * LH:4 * LH]
        c = f_g * c + i_g * g_g
        h = o_g * jnp.tanh(c)
        h_scratch[:, t, :] = h          # lane-dense (32-wide) scratch store

    # ---------------- fc head: single matmul over all hidden states --------
    out_flat = h_scratch[...].reshape(B * T, LH)                      # [N, LH]
    y = (jnp.dot(out_flat, wfc_ref[...], preferred_element_type=jnp.float32)
         + bfc_ref[0, 0])                                             # [N, 1]
    y_ref[...] = y


def seqvl_forward(x, eps, vae_p, lstm_p):
    B, T, W = x.shape
    N = B * T
    Z = eps.shape[1]
    H = vae_p["we1"].shape[1]
    LH = lstm_p["whh"].shape[0]
    x_flat = x.reshape(N, W)                     # free XLA reshape (row-major)

    full2 = lambda i: (0, 0)
    vmem = lambda shape: pl.BlockSpec(shape, full2)

    xhat_flat, mulv, y_flat = pl.pallas_call(
        _seqvl_kernel,
        out_shape=(jax.ShapeDtypeStruct((N, W), jnp.float32),
                   jax.ShapeDtypeStruct((N, 2 * Z), jnp.float32),
                   jax.ShapeDtypeStruct((N, 1), jnp.float32)),
        grid_spec=pltpu.PrefetchScalarGridSpec(
            num_scalar_prefetch=0,
            grid=(1,),
            in_specs=[
                vmem((N, W)),                    # x_flat
                vmem((N, Z)),                    # eps
                vmem((W, H)),                    # we1
                vmem((1, H)),                    # be1
                vmem((H, 2 * Z)),                # wmulv (wmu | wlv)
                vmem((1, 2 * Z)),                # bmulv (bmu | blv)
                vmem((Z, H)),                    # wd1
                vmem((1, H)),                    # bd1
                vmem((H, W)),                    # wd2
                vmem((1, W)),                    # bd2
                vmem((W, 4 * LH)),               # wih (transposed, gate order i,f,g,o)
                vmem((LH, 4 * LH)),              # whh (transposed)
                vmem((1, 4 * LH)),               # b = b_ih + b_hh
                vmem((LH, 1)),                   # wfc
                pl.BlockSpec(memory_space=pltpu.MemorySpace.SMEM),   # bfc scalar
            ],
            out_specs=[
                vmem((N, W)),                    # x_hat (flat)
                vmem((N, 2 * Z)),                # mu | logvar combined
                vmem((N, 1)),                    # y_hat (flat)
            ],
            scratch_shapes=[pltpu.VMEM((B, T, LH), jnp.float32)],
        ),
        compiler_params=pltpu.CompilerParams(
            dimension_semantics=("arbitrary",)),
    )(x_flat, eps,
      vae_p["we1"], vae_p["be1"], vae_p["wmulv"], vae_p["bmulv"],
      vae_p["wd1"], vae_p["bd1"], vae_p["wd2"], vae_p["bd2"],
      lstm_p["wih"], lstm_p["whh"], lstm_p["b"], lstm_p["wfc"], lstm_p["bfc"])

    x_hat = xhat_flat.reshape(B, T, W)
    mu = mulv[:, :Z]
    logvar = mulv[:, Z:]
    y_hat = y_flat.reshape(B, T, 1)
    return x_hat, mu, logvar, y_hat


# ----------------------------------------------------------------------------
# Pure-JAX reference for a numerical sanity check.
# ----------------------------------------------------------------------------
def reference_forward(x, eps, vp, lp):
    B, T, W = x.shape
    Z = eps.shape[1]
    xf = x.reshape(B * T, W)
    h1 = jax.nn.relu(xf @ vp["we1"] + vp["be1"])
    mulv = h1 @ vp["wmulv"] + vp["bmulv"]
    mu, logvar = mulv[:, :Z], mulv[:, Z:]
    z = mu + jnp.exp(0.5 * logvar) * eps
    h2 = jax.nn.relu(z @ vp["wd1"] + vp["bd1"])
    x_hat = (h2 @ vp["wd2"] + vp["bd2"]).reshape(B, T, W)
    H = lp["whh"].shape[0]

    def step(carry, xt):
        h, c = carry
        gates = xt @ lp["wih"] + h @ lp["whh"] + lp["b"]
        i = jax.nn.sigmoid(gates[:, :H])
        f = jax.nn.sigmoid(gates[:, H:2 * H])
        g = jnp.tanh(gates[:, 2 * H:3 * H])
        o = jax.nn.sigmoid(gates[:, 3 * H:])
        c = f * c + i * g
        h = o * jnp.tanh(c)
        return (h, c), h

    (_, _), outs = lax.scan(step,
                            (jnp.zeros((B, H), jnp.float32),
                             jnp.zeros((B, H), jnp.float32)),
                            jnp.swapaxes(x_hat, 0, 1))
    out = jnp.swapaxes(outs, 0, 1)
    y_hat = out @ lp["wfc"] + lp["bfc"]
    return x_hat, mu, logvar, y_hat


if __name__ == "__main__":
    key = jax.random.PRNGKey(0)
    ks = jax.random.split(key, 20)

    def init(k, shape, scale=0.1):
        return (scale * jax.random.normal(k, shape)).astype(jnp.float32)

    W, T, H, Z, LH, B = WINDOW_SIZE, WINDOW_COUNT, H_DIM, Z_DIM, L_H_DIM, BATCH

    vae_p = {
        "we1":   init(ks[0], (W, H)),      "be1":   init(ks[1], (1, H)),
        "wmulv": init(ks[2], (H, 2 * Z)),  "bmulv": init(ks[3], (1, 2 * Z)),
        "wd1":   init(ks[4], (Z, H)),      "bd1":   init(ks[5], (1, H)),
        "wd2":   init(ks[6], (H, W)),      "bd2":   init(ks[7], (1, W)),
    }
    lstm_p = {
        "wih": init(ks[8],  (W, 4 * LH)),      # = weight_ih_l0.T, gates (i,f,g,o)
        "whh": init(ks[9],  (LH, 4 * LH)),     # = weight_hh_l0.T
        "b":   init(ks[10], (1, 4 * LH)),      # = b_ih + b_hh (fused)
        "wfc": init(ks[11], (LH, 1)),
        "bfc": init(ks[12], (1, 1)),
    }

    x = init(ks[13], (B, T, W), scale=1.0)                    # [batch, window_count, window_size]
    eps = jax.random.normal(ks[14], (B * T, Z), jnp.float32)  # reparameterization noise
    # TODO(synk): PyTorch draws eps via torch.randn inside forward; here it is an
    # explicit input so the Pallas kernel stays deterministic and checkable.

    x_hat, mu, logvar, y_hat = seqvl_forward(x, eps, vae_p, lstm_p)
    jax.block_until_ready((x_hat, mu, logvar, y_hat))

    # Sanity check vs. pure-JAX reference (same eps).
    r_xhat, r_mu, r_lv, r_y = reference_forward(x, eps, vae_p, lstm_p)
    assert jnp.allclose(x_hat, r_xhat, atol=2e-3, rtol=2e-3)
    assert jnp.allclose(mu, r_mu, atol=2e-3, rtol=2e-3)
    assert jnp.allclose(logvar, r_lv, atol=2e-3, rtol=2e-3)
    assert jnp.allclose(y_hat, r_y, atol=2e-3, rtol=2e-3)

    print("KERNEL_OK")
</pallas_src>

<mosaic_0001>
module attributes {stable_mosaic.version = 11 : i64} {
  func.func @_seqvl_kernel(%arg0: i32, %arg1: memref<16x16xf32, #tpu.memory_space<vmem>>, %arg2: memref<16x8xf32, #tpu.memory_space<vmem>>, %arg3: memref<16x32xf32, #tpu.memory_space<vmem>>, %arg4: memref<1x32xf32, #tpu.memory_space<vmem>>, %arg5: memref<32x16xf32, #tpu.memory_space<vmem>>, %arg6: memref<1x16xf32, #tpu.memory_space<vmem>>, %arg7: memref<8x32xf32, #tpu.memory_space<vmem>>, %arg8: memref<1x32xf32, #tpu.memory_space<vmem>>, %arg9: memref<32x16xf32, #tpu.memory_space<vmem>>, %arg10: memref<1x16xf32, #tpu.memory_space<vmem>>, %arg11: memref<16x128xf32, #tpu.memory_space<vmem>>, %arg12: memref<32x128xf32, #tpu.memory_space<vmem>>, %arg13: memref<1x128xf32, #tpu.memory_space<vmem>>, %arg14: memref<32x1xf32, #tpu.memory_space<vmem>>, %arg15: memref<1x1xf32, #tpu.memory_space<smem>>, %arg16: memref<16x16xf32, #tpu.memory_space<vmem>>, %arg17: memref<16x16xf32, #tpu.memory_space<vmem>>, %arg18: memref<16x1xf32, #tpu.memory_space<vmem>>, %arg19: memref<2x8x32xf32, #tpu.memory_space<vmem>>) attributes {dimension_semantics = [#tpu.dimension_semantics<arbitrary>], iteration_bounds = array<i64: 1>, scalar_prefetch = 0 : i64, scratch_operands = 1 : i64, tpu.core_type = #tpu.core_type<tc>, window_params = [{pipeline_mode = #tpu.pipeline_mode<synchronous>, transform_indices = @transform_0, window_bounds = array<i64: 16, 16>}, {pipeline_mode = #tpu.pipeline_mode<synchronous>, transform_indices = @transform_1, window_bounds = array<i64: 16, 8>}, {pipeline_mode = #tpu.pipeline_mode<synchronous>, transform_indices = @transform_2, window_bounds = array<i64: 16, 32>}, {pipeline_mode = #tpu.pipeline_mode<synchronous>, transform_indices = @transform_3, window_bounds = array<i64: 1, 32>}, {pipeline_mode = #tpu.pipeline_mode<synchronous>, transform_indices = @transform_4, window_bounds = array<i64: 32, 16>}, {pipeline_mode = #tpu.pipeline_mode<synchronous>, transform_indices = @transform_5, window_bounds = array<i64: 1, 16>}, {pipeline_mode = #tpu.pipeline_mode<synchronous>, transform_indices = @transform_6, window_bounds = array<i64: 8, 32>}, {pipeline_mode = #tpu.pipeline_mode<synchronous>, transform_indices = @transform_7, window_bounds = array<i64: 1, 32>}, {pipeline_mode = #tpu.pipeline_mode<synchronous>, transform_indices = @transform_8, window_bounds = array<i64: 32, 16>}, {pipeline_mode = #tpu.pipeline_mode<synchronous>, transform_indices = @transform_9, window_bounds = array<i64: 1, 16>}, {pipeline_mode = #tpu.pipeline_mode<synchronous>, transform_indices = @transform_10, window_bounds = array<i64: 16, 128>}, {pipeline_mode = #tpu.pipeline_mode<synchronous>, transform_indices = @transform_11, window_bounds = array<i64: 32, 128>}, {pipeline_mode = #tpu.pipeline_mode<synchronous>, transform_indices = @transform_12, window_bounds = array<i64: 1, 128>}, {pipeline_mode = #tpu.pipeline_mode<synchronous>, transform_indices = @transform_13, window_bounds = array<i64: 32, 1>}, {transform_indices = @transform_14, window_bounds = array<i64: 1, 1>}, {pipeline_mode = #tpu.pipeline_mode<synchronous>, transform_indices = @transform_15, window_bounds = array<i64: 16, 16>}, {pipeline_mode = #tpu.pipeline_mode<synchronous>, transform_indices = @transform_16, window_bounds = array<i64: 16, 16>}, {pipeline_mode = #tpu.pipeline_mode<synchronous>, transform_indices = @transform_17, window_bounds = array<i64: 16, 1>}]} {
    %c0 = arith.constant 0 : index
    %c0_0 = arith.constant 0 : index
    %0 = vector.load %arg1[%c0, %c0_0] : memref<16x16xf32, #tpu.memory_space<vmem>>, vector<16x16xf32>
    %c0_1 = arith.constant 0 : index
    %c0_2 = arith.constant 0 : index
    %1 = vector.load %arg3[%c0_1, %c0_2] : memref<16x32xf32, #tpu.memory_space<vmem>>, vector<16x32xf32>
    %cst = arith.constant dense<0.000000e+00> : vector<16x32xf32>
    %2 = tpu.matmul %0, %1, %cst {dimension_numbers = #tpu.dot_dimension_numbers<[1], [0], [0], [1], [0, 0, 1, 1], [], []>} : vector<16x16xf32>, vector<16x32xf32>, vector<16x32xf32> -> vector<16x32xf32>
    %c0_3 = arith.constant 0 : index
    %c0_4 = arith.constant 0 : index
    %3 = vector.load %arg4[%c0_3, %c0_4] : memref<1x32xf32, #tpu.memory_space<vmem>>, vector<1x32xf32>
    %4 = vector.broadcast %3 : vector<1x32xf32> to vector<16x32xf32>
    %5 = arith.addf %2, %4 : vector<16x32xf32>
    %cst_5 = arith.constant 0.000000e+00 : f32
    %6 = vector.broadcast %cst_5 : f32 to vector<16x32xf32>
    %7 = arith.maximumf %5, %6 : vector<16x32xf32>
    %c0_6 = arith.constant 0 : index
    %c0_7 = arith.constant 0 : index
    %8 = vector.load %arg5[%c0_6, %c0_7] : memref<32x16xf32, #tpu.memory_space<vmem>>, vector<32x16xf32>
    %cst_8 = arith.constant dense<0.000000e+00> : vector<16x16xf32>
    %9 = tpu.matmul %7, %8, %cst_8 {dimension_numbers = #tpu.dot_dimension_numbers<[1], [0], [0], [1], [0, 0, 1, 1], [], []>} : vector<16x32xf32>, vector<32x16xf32>, vector<16x16xf32> -> vector<16x16xf32>
    %c0_9 = arith.constant 0 : index
    %c0_10 = arith.constant 0 : index
    %10 = vector.load %arg6[%c0_9, %c0_10] : memref<1x16xf32, #tpu.memory_space<vmem>>, vector<1x16xf32>
    %11 = vector.broadcast %10 : vector<1x16xf32> to vector<16x16xf32>
    %12 = arith.addf %9, %11 : vector<16x16xf32>
    %c0_11 = arith.constant 0 : index
    %c0_12 = arith.constant 0 : index
    %13 = vector.load %arg17[%c0_11, %c0_12] : memref<16x16xf32, #tpu.memory_space<vmem>>, vector<16x16xf32>
    tpu.vector_store %arg17[%c0_11, %c0_12], %12 {strides = array<i32>} : memref<16x16xf32, #tpu.memory_space<vmem>>, vector<16x16xf32>,
    %14 = vector.extract_strided_slice %12 {offsets = [0, 0], sizes = [16, 8], strides = [1, 1]} : vector<16x16xf32> to vector<16x8xf32>
    %15 = vector.extract_strided_slice %12 {offsets = [0, 8], sizes = [16, 8], strides = [1, 1]} : vector<16x16xf32> to vector<16x8xf32>
    %cst_13 = arith.constant 5.000000e-01 : f32
    %16 = vector.broadcast %cst_13 : f32 to vector<16x8xf32>
    %17 = arith.mulf %16, %15 : vector<16x8xf32>
    %18 = math.exp %17 : vector<16x8xf32>
    %c0_14 = arith.constant 0 : index
    %c0_15 = arith.constant 0 : index
    %19 = vector.load %arg2[%c0_14, %c0_15] : memref<16x8xf32, #tpu.memory_space<vmem>>, vector<16x8xf32>
    %20 = arith.mulf %18, %19 : vector<16x8xf32>
    %21 = arith.addf %14, %20 : vector<16x8xf32>
    %c0_16 = arith.constant 0 : index
    %c0_17 = arith.constant 0 : index
    %22 = vector.load %arg7[%c0_16, %c0_17] : memref<8x32xf32, #tpu.memory_space<vmem>>, vector<8x32xf32>
    %cst_18 = arith.constant dense<0.000000e+00> : vector<16x32xf32>
    %23 = tpu.matmul %21, %22, %cst_18 {dimension_numbers = #tpu.dot_dimension_numbers<[1], [0], [0], [1], [0, 0, 1, 1], [], []>} : vector<16x8xf32>, vector<8x32xf32>, vector<16x32xf32> -> vector<16x32xf32>
    %c0_19 = arith.constant 0 : index
    %c0_20 = arith.constant 0 : index
    %24 = vector.load %arg8[%c0_19, %c0_20] : memref<1x32xf32, #tpu.memory_space<vmem>>, vector<1x32xf32>
    %25 = vector.broadcast %24 : vector<1x32xf32> to vector<16x32xf32>
    %26 = arith.addf %23, %25 : vector<16x32xf32>
    %cst_21 = arith.constant 0.000000e+00 : f32
    %27 = vector.broadcast %cst_21 : f32 to vector<16x32xf32>
    %28 = arith.maximumf %26, %27 : vector<16x32xf32>
    %c0_22 = arith.constant 0 : index
    %c0_23 = arith.constant 0 : index
    %29 = vector.load %arg9[%c0_22, %c0_23] : memref<32x16xf32, #tpu.memory_space<vmem>>, vector<32x16xf32>
    %cst_24 = arith.constant dense<0.000000e+00> : vector<16x16xf32>
    %30 = tpu.matmul %28, %29, %cst_24 {dimension_numbers = #tpu.dot_dimension_numbers<[1], [0], [0], [1], [0, 0, 1, 1], [], []>} : vector<16x32xf32>, vector<32x16xf32>, vector<16x16xf32> -> vector<16x16xf32>
    %c0_25 = arith.constant 0 : index
    %c0_26 = arith.constant 0 : index
    %31 = vector.load %arg10[%c0_25, %c0_26] : memref<1x16xf32, #tpu.memory_space<vmem>>, vector<1x16xf32>
    %32 = vector.broadcast %31 : vector<1x16xf32> to vector<16x16xf32>
    %33 = arith.addf %30, %32 : vector<16x16xf32>
    %c0_27 = arith.constant 0 : index
    %c0_28 = arith.constant 0 : index
    %34 = vector.load %arg16[%c0_27, %c0_28] : memref<16x16xf32, #tpu.memory_space<vmem>>, vector<16x16xf32>
    tpu.vector_store %arg16[%c0_27, %c0_28], %33 {strides = array<i32>} : memref<16x16xf32, #tpu.memory_space<vmem>>, vector<16x16xf32>,
    %c0_29 = arith.constant 0 : index
    %c0_30 = arith.constant 0 : index
    %35 = vector.load %arg11[%c0_29, %c0_30] : memref<16x128xf32, #tpu.memory_space<vmem>>, vector<16x128xf32>
    %cst_31 = arith.constant dense<0.000000e+00> : vector<16x128xf32>
    %36 = tpu.matmul %33, %35, %cst_31 {dimension_numbers = #tpu.dot_dimension_numbers<[1], [0], [0], [1], [0, 0, 1, 1], [], []>} : vector<16x16xf32>, vector<16x128xf32>, vector<16x128xf32> -> vector<16x128xf32>
    %c0_32 = arith.constant 0 : index
    %c0_33 = arith.constant 0 : index
    %37 = vector.load %arg13[%c0_32, %c0_33] : memref<1x128xf32, #tpu.memory_space<vmem>>, vector<1x128xf32>
    %38 = vector.broadcast %37 : vector<1x128xf32> to vector<16x128xf32>
    %39 = arith.addf %36, %38 : vector<16x128xf32>
    %40 = vector.shape_cast %39 : vector<16x128xf32> to vector<2x8x128xf32>
    %c0_34 = arith.constant 0 : index
    %c0_35 = arith.constant 0 : index
    %41 = vector.load %arg12[%c0_34, %c0_35] : memref<32x128xf32, #tpu.memory_space<vmem>>, vector<32x128xf32>
    %cst_36 = arith.constant 0.000000e+00 : f32
    %42 = vector.broadcast %cst_36 : f32 to vector<2x32xf32>
    %cst_37 = arith.constant 0.000000e+00 : f32
    %43 = vector.broadcast %cst_37 : f32 to vector<2x32xf32>
    %44 = vector.extract_strided_slice %40 {offsets = [0, 0, 0], sizes = [2, 1, 128], strides = [1, 1, 1]} : vector<2x8x128xf32> to vector<2x1x128xf32>
    %45 = vector.shape_cast %44 : vector<2x1x128xf32> to vector<2x128xf32>
    %cst_38 = arith.constant dense<0.000000e+00> : vector<2x128xf32>
    %46 = tpu.matmul %42, %41, %cst_38 {dimension_numbers = #tpu.dot_dimension_numbers<[1], [0], [0], [1], [0, 0, 1, 1], [], []>} : vector<2x32xf32>, vector<32x128xf32>, vector<2x128xf32> -> vector<2x128xf32>
    %47 = arith.addf %45, %46 : vector<2x128xf32>
    %48 = arith.negf %47 : vector<2x128xf32>
    %49 = math.exp %48 : vector<2x128xf32>
    %cst_39 = arith.constant 1.000000e+00 : f32
    %50 = vector.broadcast %cst_39 : f32 to vector<2x128xf32>
    %51 = arith.addf %50, %49 : vector<2x128xf32>
    %52 = arith.divf %50, %51 : vector<2x128xf32>
    %53 = math.tanh %47 : vector<2x128xf32>
    %54 = vector.extract_strided_slice %52 {offsets = [0, 0], sizes = [2, 32], strides = [1, 1]} : vector<2x128xf32> to vector<2x32xf32>
    %55 = vector.extract_strided_slice %52 {offsets = [0, 32], sizes = [2, 32], strides = [1, 1]} : vector<2x128xf32> to vector<2x32xf32>
    %56 = vector.extract_strided_slice %53 {offsets = [0, 64], sizes = [2, 32], strides = [1, 1]} : vector<2x128xf32> to vector<2x32xf32>
    %57 = vector.extract_strided_slice %52 {offsets = [0, 96], sizes = [2, 32], strides = [1, 1]} : vector<2x128xf32> to vector<2x32xf32>
    %58 = arith.mulf %55, %43 : vector<2x32xf32>
    %59 = arith.mulf %54, %56 : vector<2x32xf32>
    %60 = arith.addf %58, %59 : vector<2x32xf32>
    %61 = math.tanh %60 : vector<2x32xf32>
    %62 = arith.mulf %57, %61 : vector<2x32xf32>
    %c0_40 = arith.constant 0 : index
    %c0_41 = arith.constant 0 : index
    %c0_42 = arith.constant 0 : index
    %63 = vector.load %arg19[%c0_40, %c0_41, %c0_42] : memref<2x8x32xf32, #tpu.memory_space<vmem>>, vector<2x1x32xf32>
    %64 = vector.shape_cast %63 : vector<2x1x32xf32> to vector<2x32xf32>
    %65 = vector.shape_cast %62 : vector<2x32xf32> to vector<2x1x32xf32>
    tpu.vector_store %arg19[%c0_40, %c0_41, %c0_42], %65 {strides = array<i32>} : memref<2x8x32xf32, #tpu.memory_space<vmem>>, vector<2x1x32xf32>,
    %66 = vector.extract_strided_slice %40 {offsets = [0, 1, 0], sizes = [2, 1, 128], strides = [1, 1, 1]} : vector<2x8x128xf32> to vector<2x1x128xf32>
    %67 = vector.shape_cast %66 : vector<2x1x128xf32> to vector<2x128xf32>
    %cst_43 = arith.constant dense<0.000000e+00> : vector<2x128xf32>
    %68 = tpu.matmul %62, %41, %cst_43 {dimension_numbers = #tpu.dot_dimension_numbers<[1], [0], [0], [1], [0, 0, 1, 1], [], []>} : vector<2x32xf32>, vector<32x128xf32>, vector<2x128xf32> -> vector<2x128xf32>
    %69 = arith.addf %67, %68 : vector<2x128xf32>
    %70 = arith.negf %69 : vector<2x128xf32>
    %71 = math.exp %70 : vector<2x128xf32>
    %cst_44 = arith.constant 1.000000e+00 : f32
    %72 = vector.broadcast %cst_44 : f32 to vector<2x128xf32>
    %73 = arith.addf %72, %71 : vector<2x128xf32>
    %74 = arith.divf %72, %73 : vector<2x128xf32>
    %75 = math.tanh %69 : vector<2x128xf32>
    %76 = vector.extract_strided_slice %74 {offsets = [0, 0], sizes = [2, 32], strides = [1, 1]} : vector<2x128xf32> to vector<2x32xf32>
    %77 = vector.extract_strided_slice %74 {offsets = [0, 32], sizes = [2, 32], strides = [1, 1]} : vector<2x128xf32> to vector<2x32xf32>
    %78 = vector.extract_strided_slice %75 {offsets = [0, 64], sizes = [2, 32], strides = [1, 1]} : vector<2x128xf32> to vector<2x32xf32>
    %79 = vector.extract_strided_slice %74 {offsets = [0, 96], sizes = [2, 32], strides = [1, 1]} : vector<2x128xf32> to vector<2x32xf32>
    %80 = arith.mulf %77, %60 : vector<2x32xf32>
    %81 = arith.mulf %76, %78 : vector<2x32xf32>
    %82 = arith.addf %80, %81 : vector<2x32xf32>
    %83 = math.tanh %82 : vector<2x32xf32>
    %84 = arith.mulf %79, %83 : vector<2x32xf32>
    %c0_45 = arith.constant 0 : index
    %c1 = arith.constant 1 : index
    %c0_46 = arith.constant 0 : index
    %85 = vector.load %arg19[%c0_45, %c1, %c0_46] : memref<2x8x32xf32, #tpu.memory_space<vmem>>, vector<2x1x32xf32>
    %86 = vector.shape_cast %85 : vector<2x1x32xf32> to vector<2x32xf32>
    %87 = vector.shape_cast %84 : vector<2x32xf32> to vector<2x1x32xf32>
    tpu.vector_store %arg19[%c0_45, %c1, %c0_46], %87 {strides = array<i32>} : memref<2x8x32xf32, #tpu.memory_space<vmem>>, vector<2x1x32xf32>,
    %88 = vector.extract_strided_slice %40 {offsets = [0, 2, 0], sizes = [2, 1, 128], strides = [1, 1, 1]} : vector<2x8x128xf32> to vector<2x1x128xf32>
    %89 = vector.shape_cast %88 : vector<2x1x128xf32> to vector<2x128xf32>
    %cst_47 = arith.constant dense<0.000000e+00> : vector<2x128xf32>
    %90 = tpu.matmul %84, %41, %cst_47 {dimension_numbers = #tpu.dot_dimension_numbers<[1], [0], [0], [1], [0, 0, 1, 1], [], []>} : vector<2x32xf32>, vector<32x128xf32>, vector<2x128xf32> -> vector<2x128xf32>
    %91 = arith.addf %89, %90 : vector<2x128xf32>
    %92 = arith.negf %91 : vector<2x128xf32>
    %93 = math.exp %92 : vector<2x128xf32>
    %cst_48 = arith.constant 1.000000e+00 : f32
    %94 = vector.broadcast %cst_48 : f32 to vector<2x128xf32>
    %95 = arith.addf %94, %93 : vector<2x128xf32>
    %96 = arith.divf %94, %95 : vector<2x128xf32>
    %97 = math.tanh %91 : vector<2x128xf32>
    %98 = vector.extract_strided_slice %96 {offsets = [0, 0], sizes = [2, 32], strides = [1, 1]} : vector<2x128xf32> to vector<2x32xf32>
    %99 = vector.extract_strided_slice %96 {offsets = [0, 32], sizes = [2, 32], strides = [1, 1]} : vector<2x128xf32> to vector<2x32xf32>
    %100 = vector.extract_strided_slice %97 {offsets = [0, 64], sizes = [2, 32], strides = [1, 1]} : vector<2x128xf32> to vector<2x32xf32>
    %101 = vector.extract_strided_slice %96 {offsets = [0, 96], sizes = [2, 32], strides = [1, 1]} : vector<2x128xf32> to vector<2x32xf32>
    %102 = arith.mulf %99, %82 : vector<2x32xf32>
    %103 = arith.mulf %98, %100 : vector<2x32xf32>
    %104 = arith.addf %102, %103 : vector<2x32xf32>
    %105 = math.tanh %104 : vector<2x32xf32>
    %106 = arith.mulf %101, %105 : vector<2x32xf32>
    %c0_49 = arith.constant 0 : index
    %c2 = arith.constant 2 : index
    %c0_50 = arith.constant 0 : index
    %107 = vector.load %arg19[%c0_49, %c2, %c0_50] : memref<2x8x32xf32, #tpu.memory_space<vmem>>, vector<2x1x32xf32>
    %108 = vector.shape_cast %107 : vector<2x1x32xf32> to vector<2x32xf32>
    %109 = vector.shape_cast %106 : vector<2x32xf32> to vector<2x1x32xf32>
    tpu.vector_store %arg19[%c0_49, %c2, %c0_50], %109 {strides = array<i32>} : memref<2x8x32xf32, #tpu.memory_space<vmem>>, vector<2x1x32xf32>,
    %110 = vector.extract_strided_slice %40 {offsets = [0, 3, 0], sizes = [2, 1, 128], strides = [1, 1, 1]} : vector<2x8x128xf32> to vector<2x1x128xf32>
    %111 = vector.shape_cast %110 : vector<2x1x128xf32> to vector<2x128xf32>
    %cst_51 = arith.constant dense<0.000000e+00> : vector<2x128xf32>
    %112 = tpu.matmul %106, %41, %cst_51 {dimension_numbers = #tpu.dot_dimension_numbers<[1], [0], [0], [1], [0, 0, 1, 1], [], []>} : vector<2x32xf32>, vector<32x128xf32>, vector<2x128xf32> -> vector<2x128xf32>
    %113 = arith.addf %111, %112 : vector<2x128xf32>
    %114 = arith.negf %113 : vector<2x128xf32>
    %115 = math.exp %114 : vector<2x128xf32>
    %cst_52 = arith.constant 1.000000e+00 : f32
    %116 = vector.broadcast %cst_52 : f32 to vector<2x128xf32>
    %117 = arith.addf %116, %115 : vector<2x128xf32>
    %118 = arith.divf %116, %117 : vector<2x128xf32>
    %119 = math.tanh %113 : vector<2x128xf32>
    %120 = vector.extract_strided_slice %118 {offsets = [0, 0], sizes = [2, 32], strides = [1, 1]} : vector<2x128xf32> to vector<2x32xf32>
    %121 = vector.extract_strided_slice %118 {offsets = [0, 32], sizes = [2, 32], strides = [1, 1]} : vector<2x128xf32> to vector<2x32xf32>
    %122 = vector.extract_strided_slice %119 {offsets = [0, 64], sizes = [2, 32], strides = [1, 1]} : vector<2x128xf32> to vector<2x32xf32>
    %123 = vector.extract_strided_slice %118 {offsets = [0, 96], sizes = [2, 32], strides = [1, 1]} : vector<2x128xf32> to vector<2x32xf32>
    %124 = arith.mulf %121, %104 : vector<2x32xf32>
    %125 = arith.mulf %120, %122 : vector<2x32xf32>
    %126 = arith.addf %124, %125 : vector<2x32xf32>
    %127 = math.tanh %126 : vector<2x32xf32>
    %128 = arith.mulf %123, %127 : vector<2x32xf32>
    %c0_53 = arith.constant 0 : index
    %c3 = arith.constant 3 : index
    %c0_54 = arith.constant 0 : index
    %129 = vector.load %arg19[%c0_53, %c3, %c0_54] : memref<2x8x32xf32, #tpu.memory_space<vmem>>, vector<2x1x32xf32>
    %130 = vector.shape_cast %129 : vector<2x1x32xf32> to vector<2x32xf32>
    %131 = vector.shape_cast %128 : vector<2x32xf32> to vector<2x1x32xf32>
    tpu.vector_store %arg19[%c0_53, %c3, %c0_54], %131 {strides = array<i32>} : memref<2x8x32xf32, #tpu.memory_space<vmem>>, vector<2x1x32xf32>,
    %132 = vector.extract_strided_slice %40 {offsets = [0, 4, 0], sizes = [2, 1, 128], strides = [1, 1, 1]} : vector<2x8x128xf32> to vector<2x1x128xf32>
    %133 = vector.shape_cast %132 : vector<2x1x128xf32> to vector<2x128xf32>
    %cst_55 = arith.constant dense<0.000000e+00> : vector<2x128xf32>
    %134 = tpu.matmul %128, %41, %cst_55 {dimension_numbers = #tpu.dot_dimension_numbers<[1], [0], [0], [1], [0, 0, 1, 1], [], []>} : vector<2x32xf32>, vector<32x128xf32>, vector<2x128xf32> -> vector<2x128xf32>
    %135 = arith.addf %133, %134 : vector<2x128xf32>
    %136 = arith.negf %135 : vector<2x128xf32>
    %137 = math.exp %136 : vector<2x128xf32>
    %cst_56 = arith.constant 1.000000e+00 : f32
    %138 = vector.broadcast %cst_56 : f32 to vector<2x128xf32>
    %139 = arith.addf %138, %137 : vector<2x128xf32>
    %140 = arith.divf %138, %139 : vector<2x128xf32>
    %141 = math.tanh %135 : vector<2x128xf32>
    %142 = vector.extract_strided_slice %140 {offsets = [0, 0], sizes = [2, 32], strides = [1, 1]} : vector<2x128xf32> to vector<2x32xf32>
    %143 = vector.extract_strided_slice %140 {offsets = [0, 32], sizes = [2, 32], strides = [1, 1]} : vector<2x128xf32> to vector<2x32xf32>
    %144 = vector.extract_strided_slice %141 {offsets = [0, 64], sizes = [2, 32], strides = [1, 1]} : vector<2x128xf32> to vector<2x32xf32>
    %145 = vector.extract_strided_slice %140 {offsets = [0, 96], sizes = [2, 32], strides = [1, 1]} : vector<2x128xf32> to vector<2x32xf32>
    %146 = arith.mulf %143, %126 : vector<2x32xf32>
    %147 = arith.mulf %142, %144 : vector<2x32xf32>
    %148 = arith.addf %146, %147 : vector<2x32xf32>
    %149 = math.tanh %148 : vector<2x32xf32>
    %150 = arith.mulf %145, %149 : vector<2x32xf32>
    %c0_57 = arith.constant 0 : index
    %c4 = arith.constant 4 : index
    %c0_58 = arith.constant 0 : index
    %151 = vector.load %arg19[%c0_57, %c4, %c0_58] : memref<2x8x32xf32, #tpu.memory_space<vmem>>, vector<2x1x32xf32>
    %152 = vector.shape_cast %151 : vector<2x1x32xf32> to vector<2x32xf32>
    %153 = vector.shape_cast %150 : vector<2x32xf32> to vector<2x1x32xf32>
    tpu.vector_store %arg19[%c0_57, %c4, %c0_58], %153 {strides = array<i32>} : memref<2x8x32xf32, #tpu.memory_space<vmem>>, vector<2x1x32xf32>,
    %154 = vector.extract_strided_slice %40 {offsets = [0, 5, 0], sizes = [2, 1, 128], strides = [1, 1, 1]} : vector<2x8x128xf32> to vector<2x1x128xf32>
    %155 = vector.shape_cast %154 : vector<2x1x128xf32> to vector<2x128xf32>
    %cst_59 = arith.constant dense<0.000000e+00> : vector<2x128xf32>
    %156 = tpu.matmul %150, %41, %cst_59 {dimension_numbers = #tpu.dot_dimension_numbers<[1], [0], [0], [1], [0, 0, 1, 1], [], []>} : vector<2x32xf32>, vector<32x128xf32>, vector<2x128xf32> -> vector<2x128xf32>
    %157 = arith.addf %155, %156 : vector<2x128xf32>
    %158 = arith.negf %157 : vector<2x128xf32>
    %159 = math.exp %158 : vector<2x128xf32>
    %cst_60 = arith.constant 1.000000e+00 : f32
    %160 = vector.broadcast %cst_60 : f32 to vector<2x128xf32>
    %161 = arith.addf %160, %159 : vector<2x128xf32>
    %162 = arith.divf %160, %161 : vector<2x128xf32>
    %163 = math.tanh %157 : vector<2x128xf32>
    %164 = vector.extract_strided_slice %162 {offsets = [0, 0], sizes = [2, 32], strides = [1, 1]} : vector<2x128xf32> to vector<2x32xf32>
    %165 = vector.extract_strided_slice %162 {offsets = [0, 32], sizes = [2, 32], strides = [1, 1]} : vector<2x128xf32> to vector<2x32xf32>
    %166 = vector.extract_strided_slice %163 {offsets = [0, 64], sizes = [2, 32], strides = [1, 1]} : vector<2x128xf32> to vector<2x32xf32>
    %167 = vector.extract_strided_slice %162 {offsets = [0, 96], sizes = [2, 32], strides = [1, 1]} : vector<2x128xf32> to vector<2x32xf32>
    %168 = arith.mulf %165, %148 : vector<2x32xf32>
    %169 = arith.mulf %164, %166 : vector<2x32xf32>
    %170 = arith.addf %168, %169 : vector<2x32xf32>
    %171 = math.tanh %170 : vector<2x32xf32>
    %172 = arith.mulf %167, %171 : vector<2x32xf32>
    %c0_61 = arith.constant 0 : index
    %c5 = arith.constant 5 : index
    %c0_62 = arith.constant 0 : index
    %173 = vector.load %arg19[%c0_61, %c5, %c0_62] : memref<2x8x32xf32, #tpu.memory_space<vmem>>, vector<2x1x32xf32>
    %174 = vector.shape_cast %173 : vector<2x1x32xf32> to vector<2x32xf32>
    %175 = vector.shape_cast %172 : vector<2x32xf32> to vector<2x1x32xf32>
    tpu.vector_store %arg19[%c0_61, %c5, %c0_62], %175 {strides = array<i32>} : memref<2x8x32xf32, #tpu.memory_space<vmem>>, vector<2x1x32xf32>,
    %176 = vector.extract_strided_slice %40 {offsets = [0, 6, 0], sizes = [2, 1, 128], strides = [1, 1, 1]} : vector<2x8x128xf32> to vector<2x1x128xf32>
    %177 = vector.shape_cast %176 : vector<2x1x128xf32> to vector<2x128xf32>
    %cst_63 = arith.constant dense<0.000000e+00> : vector<2x128xf32>
    %178 = tpu.matmul %172, %41, %cst_63 {dimension_numbers = #tpu.dot_dimension_numbers<[1], [0], [0], [1], [0, 0, 1, 1], [], []>} : vector<2x32xf32>, vector<32x128xf32>, vector<2x128xf32> -> vector<2x128xf32>
    %179 = arith.addf %177, %178 : vector<2x128xf32>
    %180 = arith.negf %179 : vector<2x128xf32>
    %181 = math.exp %180 : vector<2x128xf32>
    %cst_64 = arith.constant 1.000000e+00 : f32
    %182 = vector.broadcast %cst_64 : f32 to vector<2x128xf32>
    %183 = arith.addf %182, %181 : vector<2x128xf32>
    %184 = arith.divf %182, %183 : vector<2x128xf32>
    %185 = math.tanh %179 : vector<2x128xf32>
    %186 = vector.extract_strided_slice %184 {offsets = [0, 0], sizes = [2, 32], strides = [1, 1]} : vector<2x128xf32> to vector<2x32xf32>
    %187 = vector.extract_strided_slice %184 {offsets = [0, 32], sizes = [2, 32], strides = [1, 1]} : vector<2x128xf32> to vector<2x32xf32>
    %188 = vector.extract_strided_slice %185 {offsets = [0, 64], sizes = [2, 32], strides = [1, 1]} : vector<2x128xf32> to vector<2x32xf32>
    %189 = vector.extract_strided_slice %184 {offsets = [0, 96], sizes = [2, 32], strides = [1, 1]} : vector<2x128xf32> to vector<2x32xf32>
    %190 = arith.mulf %187, %170 : vector<2x32xf32>
    %191 = arith.mulf %186, %188 : vector<2x32xf32>
    %192 = arith.addf %190, %191 : vector<2x32xf32>
    %193 = math.tanh %192 : vector<2x32xf32>
    %194 = arith.mulf %189, %193 : vector<2x32xf32>
    %c0_65 = arith.constant 0 : index
    %c6 = arith.constant 6 : index
    %c0_66 = arith.constant 0 : index
    %195 = vector.load %arg19[%c0_65, %c6, %c0_66] : memref<2x8x32xf32, #tpu.memory_space<vmem>>, vector<2x1x32xf32>
    %196 = vector.shape_cast %195 : vector<2x1x32xf32> to vector<2x32xf32>
    %197 = vector.shape_cast %194 : vector<2x32xf32> to vector<2x1x32xf32>
    tpu.vector_store %arg19[%c0_65, %c6, %c0_66], %197 {strides = array<i32>} : memref<2x8x32xf32, #tpu.memory_space<vmem>>, vector<2x1x32xf32>,
    %198 = vector.extract_strided_slice %40 {offsets = [0, 7, 0], sizes = [2, 1, 128], strides = [1, 1, 1]} : vector<2x8x128xf32> to vector<2x1x128xf32>
    %199 = vector.shape_cast %198 : vector<2x1x128xf32> to vector<2x128xf32>
    %cst_67 = arith.constant dense<0.000000e+00> : vector<2x128xf32>
    %200 = tpu.matmul %194, %41, %cst_67 {dimension_numbers = #tpu.dot_dimension_numbers<[1], [0], [0], [1], [0, 0, 1, 1], [], []>} : vector<2x32xf32>, vector<32x128xf32>, vector<2x128xf32> -> vector<2x128xf32>
    %201 = arith.addf %199, %200 : vector<2x128xf32>
    %202 = arith.negf %201 : vector<2x128xf32>
    %203 = math.exp %202 : vector<2x128xf32>
    %cst_68 = arith.constant 1.000000e+00 : f32
    %204 = vector.broadcast %cst_68 : f32 to vector<2x128xf32>
    %205 = arith.addf %204, %203 : vector<2x128xf32>
    %206 = arith.divf %204, %205 : vector<2x128xf32>
    %207 = math.tanh %201 : vector<2x128xf32>
    %208 = vector.extract_strided_slice %206 {offsets = [0, 0], sizes = [2, 32], strides = [1, 1]} : vector<2x128xf32> to vector<2x32xf32>
    %209 = vector.extract_strided_slice %206 {offsets = [0, 32], sizes = [2, 32], strides = [1, 1]} : vector<2x128xf32> to vector<2x32xf32>
    %210 = vector.extract_strided_slice %207 {offsets = [0, 64], sizes = [2, 32], strides = [1, 1]} : vector<2x128xf32> to vector<2x32xf32>
    %211 = vector.extract_strided_slice %206 {offsets = [0, 96], sizes = [2, 32], strides = [1, 1]} : vector<2x128xf32> to vector<2x32xf32>
    %212 = arith.mulf %209, %192 : vector<2x32xf32>
    %213 = arith.mulf %208, %210 : vector<2x32xf32>
    %214 = arith.addf %212, %213 : vector<2x32xf32>
    %215 = math.tanh %214 : vector<2x32xf32>
    %216 = arith.mulf %211, %215 : vector<2x32xf32>
    %c0_69 = arith.constant 0 : index
    %c7 = arith.constant 7 : index
    %c0_70 = arith.constant 0 : index
    %217 = vector.load %arg19[%c0_69, %c7, %c0_70] : memref<2x8x32xf32, #tpu.memory_space<vmem>>, vector<2x1x32xf32>
    %218 = vector.shape_cast %217 : vector<2x1x32xf32> to vector<2x32xf32>
    %219 = vector.shape_cast %216 : vector<2x32xf32> to vector<2x1x32xf32>
    tpu.vector_store %arg19[%c0_69, %c7, %c0_70], %219 {strides = array<i32>} : memref<2x8x32xf32, #tpu.memory_space<vmem>>, vector<2x1x32xf32>,
    %c0_71 = arith.constant 0 : index
    %c0_72 = arith.constant 0 : index
    %c0_73 = arith.constant 0 : index
    %220 = vector.load %arg19[%c0_71, %c0_72, %c0_73] : memref<2x8x32xf32, #tpu.memory_space<vmem>>, vector<2x8x32xf32>
    %221 = vector.shape_cast %220 : vector<2x8x32xf32> to vector<16x32xf32>
    %c0_74 = arith.constant 0 : index
    %c0_75 = arith.constant 0 : index
    %222 = vector.load %arg14[%c0_74, %c0_75] : memref<32x1xf32, #tpu.memory_space<vmem>>, vector<32x1xf32>
    %cst_76 = arith.constant dense<0.000000e+00> : vector<16x1xf32>
    %223 = tpu.matmul %221, %222, %cst_76 {dimension_numbers = #tpu.dot_dimension_numbers<[1], [0], [0], [1], [0, 0, 1, 1], [], []>} : vector<16x32xf32>, vector<32x1xf32>, vector<16x1xf32> -> vector<16x1xf32>
    %c0_77 = arith.constant 0 : index
    %c0_78 = arith.constant 0 : index
    %224 = memref.load %arg15[%c0_77, %c0_78] : memref<1x1xf32, #tpu.memory_space<smem>>
    %225 = vector.broadcast %224 : f32 to vector<16x1xf32>
    %226 = arith.addf %223, %225 : vector<16x1xf32>
    %c0_79 = arith.constant 0 : index
    %c0_80 = arith.constant 0 : index
    %227 = vector.load %arg18[%c0_79, %c0_80] : memref<16x1xf32, #tpu.memory_space<vmem>>, vector<16x1xf32>
    tpu.vector_store %arg18[%c0_79, %c0_80], %226 {strides = array<i32>} : memref<16x1xf32, #tpu.memory_space<vmem>>, vector<16x1xf32>,
    return
  }
  func.func @transform_0(%arg0: i32) -> (i32, i32) {
    %c0_i32 = arith.constant 0 : i32
    %c0_i32_0 = arith.constant 0 : i32
    %c0_i32_1 = arith.constant 0 : i32
    return %c0_i32, %c0_i32_0 : i32, i32
  }
  func.func @transform_1(%arg0: i32) -> (i32, i32) {
    %c0_i32 = arith.constant 0 : i32
    %c0_i32_0 = arith.constant 0 : i32
    %c0_i32_1 = arith.constant 0 : i32
    return %c0_i32, %c0_i32_0 : i32, i32
  }
  func.func @transform_2(%arg0: i32) -> (i32, i32) {
    %c0_i32 = arith.constant 0 : i32
    %c0_i32_0 = arith.constant 0 : i32
    %c0_i32_1 = arith.constant 0 : i32
    return %c0_i32, %c0_i32_0 : i32, i32
  }
  func.func @transform_3(%arg0: i32) -> (i32, i32) {
    %c0_i32 = arith.constant 0 : i32
    %c0_i32_0 = arith.constant 0 : i32
    %c0_i32_1 = arith.constant 0 : i32
    return %c0_i32, %c0_i32_0 : i32, i32
  }
  func.func @transform_4(%arg0: i32) -> (i32, i32) {
    %c0_i32 = arith.constant 0 : i32
    %c0_i32_0 = arith.constant 0 : i32
    %c0_i32_1 = arith.constant 0 : i32
    return %c0_i32, %c0_i32_0 : i32, i32
  }
  func.func @transform_5(%arg0: i32) -> (i32, i32) {
    %c0_i32 = arith.constant 0 : i32
    %c0_i32_0 = arith.constant 0 : i32
    %c0_i32_1 = arith.constant 0 : i32
    return %c0_i32, %c0_i32_0 : i32, i32
  }
  func.func @transform_6(%arg0: i32) -> (i32, i32) {
    %c0_i32 = arith.constant 0 : i32
    %c0_i32_0 = arith.constant 0 : i32
    %c0_i32_1 = arith.constant 0 : i32
    return %c0_i32, %c0_i32_0 : i32, i32
  }
  func.func @transform_7(%arg0: i32) -> (i32, i32) {
    %c0_i32 = arith.constant 0 : i32
    %c0_i32_0 = arith.constant 0 : i32
    %c0_i32_1 = arith.constant 0 : i32
    return %c0_i32, %c0_i32_0 : i32, i32
  }
  func.func @transform_8(%arg0: i32) -> (i32, i32) {
    %c0_i32 = arith.constant 0 : i32
    %c0_i32_0 = arith.constant 0 : i32
    %c0_i32_1 = arith.constant 0 : i32
    return %c0_i32, %c0_i32_0 : i32, i32
  }
  func.func @transform_9(%arg0: i32) -> (i32, i32) {
    %c0_i32 = arith.constant 0 : i32
    %c0_i32_0 = arith.constant 0 : i32
    %c0_i32_1 = arith.constant 0 : i32
    return %c0_i32, %c0_i32_0 : i32, i32
  }
  func.func @transform_10(%arg0: i32) -> (i32, i32) {
    %c0_i32 = arith.constant 0 : i32
    %c0_i32_0 = arith.constant 0 : i32
    %c0_i32_1 = arith.constant 0 : i32
    return %c0_i32, %c0_i32_0 : i32, i32
  }
  func.func @transform_11(%arg0: i32) -> (i32, i32) {
    %c0_i32 = arith.constant 0 : i32
    %c0_i32_0 = arith.constant 0 : i32
    %c0_i32_1 = arith.constant 0 : i32
    return %c0_i32, %c0_i32_0 : i32, i32
  }
  func.func @transform_12(%arg0: i32) -> (i32, i32) {
    %c0_i32 = arith.constant 0 : i32
    %c0_i32_0 = arith.constant 0 : i32
    %c0_i32_1 = arith.constant 0 : i32
    return %c0_i32, %c0_i32_0 : i32, i32
  }
  func.func @transform_13(%arg0: i32) -> (i32, i32) {
    %c0_i32 = arith.constant 0 : i32
    %c0_i32_0 = arith.constant 0 : i32
    %c0_i32_1 = arith.constant 0 : i32
    return %c0_i32, %c0_i32_0 : i32, i32
  }
  func.func @transform_14(%arg0: i32) -> (i32, i32) {
    %c0_i32 = arith.constant 0 : i32
    %c0_i32_0 = arith.constant 0 : i32
    %c0_i32_1 = arith.constant 0 : i32
    return %c0_i32, %c0_i32_0 : i32, i32
  }
  func.func @transform_15(%arg0: i32) -> (i32, i32) {
    %c0_i32 = arith.constant 0 : i32
    %c0_i32_0 = arith.constant 0 : i32
    %c0_i32_1 = arith.constant 0 : i32
    return %c0_i32, %c0_i32_0 : i32, i32
  }
  func.func @transform_16(%arg0: i32) -> (i32, i32) {
    %c0_i32 = arith.constant 0 : i32
    %c0_i32_0 = arith.constant 0 : i32
    %c0_i32_1 = arith.constant 0 : i32
    return %c0_i32, %c0_i32_0 : i32, i32
  }
  func.func @transform_17(%arg0: i32) -> (i32, i32) {
    %c0_i32 = arith.constant 0 : i32
    %c0_i32_0 = arith.constant 0 : i32
    %c0_i32_1 = arith.constant 0 : i32
    return %c0_i32, %c0_i32_0 : i32, i32
  }
}

</mosaic_0001>

<bundles_post_ra>
// kernel: tpu_custom_call.1
= control target key start
LH: loop header
LB: loop body
LE: loop exit
PB: predicated region body
PF: predicated region fallthrough
CT: control target
= control target key end

     0   :  { %s2037_s0 = inlined_call_operand.vmem [shape: f32[16,16], index: 0, kind: input, shape index: {}]   ;;  %s2038_s1 = inlined_call_operand.vmem [shape: f32[16,8], index: 1, kind: input, shape index: {}]   ;;  %s2039_s2 = inlined_call_operand.vmem [shape: f32[16,32], index: 2, kind: input, shape index: {}]   ;;  %s2040_s3 = inlined_call_operand.vmem [shape: f32[1,32], index: 3, kind: input, shape index: {}]   ;;  %s2041_s4 = inlined_call_operand.vmem [shape: f32[32,16], index: 4, kind: input, shape index: {}]   ;;  %s2042_s5 = inlined_call_operand.vmem [shape: f32[1,16], index: 5, kind: input, shape index: {}]   ;;  %s2043_s6 = inlined_call_operand.vmem [shape: f32[8,32], index: 6, kind: input, shape index: {}]   ;;  %s2044_s7 = inlined_call_operand.vmem [shape: f32[1,32], index: 7, kind: input, shape index: {}]   ;;  %s2045_s8 = inlined_call_operand.vmem [shape: f32[32,16], index: 8, kind: input, shape index: {}]   ;;  %s2046_s9 = inlined_call_operand.vmem [shape: f32[1,16], index: 9, kind: input, shape index: {}]   ;;  %s2047_s10 = inlined_call_operand.vmem [shape: f32[16,128], index: 10, kind: input, shape index: {}]   ;;  %s2048_s11 = inlined_call_operand.vmem [shape: f32[32,128], index: 11, kind: input, shape index: {}]   ;;  %s2049_s12 = inlined_call_operand.vmem [shape: f32[1,128], index: 12, kind: input, shape index: {}]   ;;  %s2050_s13 = inlined_call_operand.vmem [shape: f32[32,1], index: 13, kind: input, shape index: {}]   ;;  %s2051_s14 = inlined_call_operand.<no memory space> [shape: f32[1,1], index: 14, kind: input, shape index: {}]   ;;  %s2052_s15 = inlined_call_operand.hbm [shape: f32[16,16], index: 15, kind: output, shape index: {0}]   ;;  %s2053_s16 = inlined_call_operand.hbm [shape: f32[16,16], index: 16, kind: output, shape index: {1}]   ;;  %s2054_s17 = inlined_call_operand.vmem [shape: f32[16,1], index: 17, kind: output, shape index: {2}]  }
   0x1   :  { %2057 = sst [smem:[#allocation10_spill]] %s2037_s0 }
   0x2   :  { %2058 = sst [smem:[#allocation11_spill]] %s2038_s1 }
   0x3   :  { %24 = vsyncpa [#allocation5], 0  ;;  %v59_v0 = vld [vmem:[%s2039_s2 + $0x8] sm:$0xff]  ;;  %v58_v1 = vld [vmem:[%s2039_s2] sm:$0xff]  ;;  %s2059_s0 = sld [smem:[#allocation10_spill]]  ;;  %vm64_vm0 = vcmask 130048  }
   0x4   :  { %85 = vmatpush.msra.mxu0 %v59_v0  ;;  %v99_v3 = vld [vmem:[%s2041_s4 + $0x18] sm:$0xff] }
   0x5   :  { %123 = vmatpush.msra.mxu1 %v99_v3  ;;  %1381 = vmatpush.msra.mxu3 %v99_v3 }
   0x6   :  { %86 = vmatpush.msra.mxu0 %v58_v1 }
   0x9   :  { %v56_v2 = vld [vmem:[%s2059_s0] sm:$0xff] }
   0xa   :  { %25 = vsyncpa [#allocation7], 0  ;;  %1346 = vmatmul.msk.f32.vlgmr.msra.gmra.mxu0 %vm64_vm0, %v56_v2  ;;  %v57_v4 = vld [vmem:[%s2059_s0 + $0x8] sm:$0xff]  ;;  %v98_v5 = vld [vmem:[%s2041_s4 + $0x10] sm:$0xff]  ;;  %s2060_s27 = sld [smem:[#allocation11_spill]]  ;;  %s1582_s28 = smov 8  }
   0xb   :  { %124 = vmatpush.msra.mxu1 %v98_v5  ;;  %1382 = vmatpush.msra.mxu3 %v98_v5  ;;  %v97_v6 = vld [vmem:[%s2041_s4 + $0x8] sm:$0xff]  ;;  %v96_v7 = vld [vmem:[%s2041_s4] sm:$0xff]  ;;  %vm104_vm1 = vcmask 261120   ;;  %v204_v33 = vld [vmem:[%s2045_s8 + $0x18] sm:$0xff]  ;;  %vm169_vm2 = vcmask 64512   ;;  %v1584_v54 = vmov 0.0  }
   0xc   :  { %v1393_v10 = vld [vmem:[%s2040_s3] ss:$0 sm:$0xff]  ;;  %s1583_s3 = smov 120   ;;  %v203_v38 = vld [vmem:[%s2045_s8 + $0x10] sm:$0xff]  ;;  %v202_v39 = vld [vmem:[%s2045_s8 + $0x8] sm:$0xff]  ;;  %vm394_vm11 = vcmask 1041409  }
   0xd   :  { %125 = vmatpush.msra.mxu1 %v97_v6  ;;  %1383 = vmatpush.msra.mxu3 %v97_v6  ;;  %v1394_v17 = vld [vmem:[%s2042_s5] ss:$0 sm:$0xff]  ;;  %v241_v41 = vld [vmem:[%s2047_s10 + $0x8] sm:$0xff]  ;;  %v278_v50 = vld [vmem:[%s2048_s11 + $0x18] sm:$0xff]  ;;  %s1587_s0 = smov [#allocation4]   ;;  %s1588_s4 = smov [#allocation6]  }
   0xe   :  { %v164_v32 = vld [vmem:[%s2043_s6] sm:$0xff]  ;;  %v277_v51 = vld [vmem:[%s2048_s11 + $0x10] sm:$0xff]  ;;  %294 = vmatpush.msrb.mxu0 %v278_v50  ;;  %v276_v52 = vld [vmem:[%s2048_s11 + $0x8] sm:$0xff]  ;;  %s1589_s19 = smov 128  }
   0xf   :  { %126 = vmatpush.msra.mxu1 %v96_v7  ;;  %1384 = vmatpush.msra.mxu3 %v96_v7  ;;  %v201_v40 = vld [vmem:[%s2045_s8] sm:$0xff]  ;;  %s1310_s8 = sshll.u32 %s1587_s0, 4  ;;  %s1311_s8 = int_to_ptr.vmem [resolvable:$true] %s1310_s8 }
  0x10   :  { %v142_v8 = vld [vmem:[%s2060_s27] sm:$0xff]  ;;  %v143_v9 = vld [vmem:[%s2060_s27 + $0x8] sm:$0xff]  ;;  %191 = vmatpush.msra.mxu2 %v164_v32  ;;  %295 = vmatpush.msrb.mxu0 %v277_v51 }
  0x11   :  { %146 = vrot.lane.b32.xlu0 %v142_v8, %s1582_s28  ;;  %227 = vmatpush.msrb.mxu3 %v204_v33  ;;  %v1395_v42 = vld [vmem:[%s2044_s7] ss:$0 sm:$0xff]  ;;  %s1323_s7 = sshll.u32 %s1588_s4, 4  ;;  %s1324_s7 = int_to_ptr.vmem [resolvable:$true] %s1323_s7 }
  0x12   :  { %1347 = vmatmul.msk.f32.gmra.mxu0 %vm64_vm0, %v57_v4  ;;  %266 = vmatpush.msrb.mxu2 %v241_v41  ;;  %v240_v49 = vld [vmem:[%s2047_s10] sm:$0xff]  ;;  %s1325_s10 = sshll.u32 %s2053_s16, 4  ;;  %s1326_s10 = int_to_ptr.hbm [resolvable:$true] %s1325_s10 }
  0x13   :  { %228 = vmatpush.msrb.mxu3 %v203_v38  ;;  %412 = vmatpush.msrb.mxu1 %v278_v50  ;;  %v275_v53 = vld [vmem:[%s2048_s11] sm:$0xff] }
  0x14   :  { %267 = vmatpush.msrb.mxu2 %v240_v49  ;;  %296 = vmatpush.msrb.mxu0 %v276_v52  ;;  %v1396_v55 = vld [vmem:[%s2046_s9] ss:$0 sm:$0xff]  ;;  %s1585_s9 = smov 64  }
  0x15   :  { %229 = vmatpush.msrb.mxu3 %v202_v39  ;;  %413 = vmatpush.msrb.mxu1 %v277_v51  ;;  %v1397_v62 = vld [vmem:[%s2049_s12] ss:$0 sm:$0xff]  ;;  %s1586_s12 = smov 32  }
  0x16   :  { %297 = vmatpush.msrb.mxu0 %v275_v53 }
  0x17   :  { %230 = vmatpush.msrb.mxu3 %v201_v40  ;;  %414 = vmatpush.msrb.mxu1 %v276_v52 }
  0x18   :  { %660 = vmatpush.msra.mxu0 %v278_v50 }
  0x19   :  { %148 = vrot.lane.b32.xlu0 %v143_v9, %s1582_s28  ;;  %415 = vmatpush.msrb.mxu1 %v275_v53 }
  0x1a   :  { %298 = vmatmul.f32.vlgmr.msrb.gmra.mxu0 %v1584_v54 }
  0x1b   :  { %661 = vmatpush.msra.mxu0 %v277_v51 }
  0x1d   :  { %662 = vmatpush.msra.mxu0 %v276_v52 }
  0x1f   :  { %663 = vmatpush.msra.mxu0 %v275_v53 }
  0x21   :  { %1160 = vmatpush.msrb.mxu0 %v278_v50 }
  0x23   :  { %1161 = vmatpush.msrb.mxu0 %v277_v51 }
  0x25   :  { %1162 = vmatpush.msrb.mxu0 %v276_v52 }
  0x27   :  { %1163 = vmatpush.msrb.mxu0 %v275_v53 }
  0x83   :  { %v147_v22 = vpop.permute.xlu0 %146 }
  0x87   :  { %v88_v11 = vpop.f32.mrf.mxu0 }
  0x88   :  { %v89_v12 = vadd.f32 %v1393_v10, %v88_v11 }
  0x8a   :  { %v94_v13 = vmax.f32 %v89_v12, 0.0 }
  0x8b   :  { %v149_v29 = vpop.permute.xlu0 %148 }
  0x8c   :  { %1348 = vmatmul.msk.f32.vlgmr.msra.gmra.mxu1 %vm104_vm1, %v94_v13 }
  0x8d   :  { %785 = vmatpush.msra.mxu1 %v278_v50 }
  0x8f   :  { %v91_v14 = vpop.f32.mrf.mxu0  ;;  %786 = vmatpush.msra.mxu1 %v277_v51 }
  0x90   :  { %v92_v15 = vadd.f32 %v1393_v10, %v91_v14 }
  0x91   :  { %787 = vmatpush.msra.mxu1 %v276_v52 }
  0x92   :  { %v95_v16 = vmax.f32 %v92_v15, 0.0 }
  0x93   :  { %788 = vmatpush.msra.mxu1 %v275_v53 }
  0x94   :  { %1349 = vmatmul.msk.f32.vlgmr.msra.gmra.mxu3 %vm104_vm1, %v95_v16 }
  0x95   :  { %535 = vmatpush.msra.mxu3 %v278_v50 }
  0x97   :  { %536 = vmatpush.msra.mxu3 %v277_v51  ;;  %v299_v61 = vpop.f32.mrf.mxu0 }
  0x98   :  { %v303_v63 = vrot.slane %v299_v61, 1 }
  0x99   :  { %537 = vmatpush.msra.mxu3 %v276_v52 }
  0x9b   :  { %538 = vmatpush.msra.mxu3 %v275_v53 }
 0x109   :  { %v128_v18 = vpop.f32.mrf.mxu1 }
 0x10a   :  { %v129_v19 = vadd.f32 %v1394_v17, %v128_v18 }
 0x10c   :  { %134 = vst.msk [vmem:[#allocation6] sm:$0xff] %vm64_vm0, %v129_v19  ;;  %v136_v20 = vmul.f32 0.5, %v129_v19 }
 0x10e   :  { %v138_v21 = vmul.f32 1.442695, %v136_v20 }
 0x110   :  { %1398 = vpow2.f32 %v138_v21 }
 0x116   :  { %v1399_v23 = vpop.eup %1398 }
 0x117   :  { %v152_v24 = vmul.f32 %v1399_v23, %v147_v22  ;;  %v131_v25 = vpop.f32.mrf.mxu3 }
 0x118   :  { %v132_v26 = vadd.f32 %v1394_v17, %v131_v25 }
 0x119   :  { %156 = vrot.lane.b32.xlu1 %v152_v24, %s1583_s3 }
 0x11a   :  { %135 = vst.msk [vmem:[#allocation6 + $0x8] sm:$0xff] %vm64_vm0, %v132_v26  ;;  %v137_v27 = vmul.f32 0.5, %v132_v26 }
 0x11b   :  { %1331 = dma.vmem_to_hbm [thread:$0]  %s1324_s7, 256, %s1326_s10, [#allocation7], %s1589_s19, %s1589_s19, %s1582_s28  }
 0x11c   :  { %v140_v28 = vmul.f32 1.442695, %v137_v27 }
 0x11e   :  { %1400 = vpow2.f32 %v140_v28 }
 0x124   :  { %v1401_v30 = vpop.eup %1400 }
 0x125   :  { %v153_v31 = vmul.f32 %v1401_v30, %v149_v29 }
 0x127   :  { %158 = vrot.lane.b32.xlu1 %v153_v31, %s1583_s3 }
 0x18b   :  { %v157_v34 = vpop.permute.xlu1 %156 }
 0x18c   :  { %v162_v35 = vadd.f32 %v157_v34, %v129_v19 }
 0x18e   :  { %1350 = vmatmul.msk.f32.vlgmr.msra.gmra.mxu2 %vm169_vm2, %v162_v35 }
 0x18f   :  { %1035 = vmatpush.msra.mxu2 %v278_v50 }
 0x191   :  { %1036 = vmatpush.msra.mxu2 %v277_v51 }
 0x193   :  { %1037 = vmatpush.msra.mxu2 %v276_v52 }
 0x195   :  { %1038 = vmatpush.msra.mxu2 %v275_v53 }
 0x199   :  { %v159_v36 = vpop.permute.xlu1 %158 }
 0x19a   :  { %v163_v37 = vadd.f32 %v159_v36, %v132_v26 }
 0x19c   :  { %1351 = vmatmul.msk.f32.gmra.mxu2 %vm169_vm2, %v163_v37 }
 0x211   :  { %v193_v43 = vpop.f32.mrf.mxu2 }
 0x212   :  { %v194_v44 = vadd.f32 %v1395_v42, %v193_v43 }
 0x214   :  { %v199_v45 = vmax.f32 %v194_v44, 0.0 }
 0x216   :  { %1352 = vmatmul.msk.f32.vlgmr.msrb.gmra.mxu3 %vm104_vm1, %v199_v45 }
 0x217   :  { %910 = vmatpush.msrb.mxu3 %v278_v50 }
 0x219   :  { %911 = vmatpush.msrb.mxu3 %v277_v51 }
 0x21b   :  { %912 = vmatpush.msrb.mxu3 %v276_v52 }
 0x21d   :  { %913 = vmatpush.msrb.mxu3 %v275_v53 }
 0x21f   :  { %v196_v46 = vpop.f32.mrf.mxu2 }
 0x220   :  { %v197_v47 = vadd.f32 %v1395_v42, %v196_v46 }
 0x222   :  { %v200_v48 = vmax.f32 %v197_v47, 0.0 }
 0x224   :  { %1353 = vmatmul.msk.f32.gmra.mxu3 %vm104_vm1, %v200_v48 }
 0x299   :  { %v232_v56 = vpop.f32.mrf.mxu3 }
 0x29a   :  { %v233_v57 = vadd.f32 %v1396_v55, %v232_v56 }
 0x29c   :  { %238 = vst.msk [vmem:[#allocation4] sm:$0xff] %vm64_vm0, %v233_v57  ;;  %1354 = vmatmul.msk.f32.vlgmr.msrb.gmra.mxu2 %vm64_vm0, %v233_v57 }
 0x2a7   :  { %v235_v58 = vpop.f32.mrf.mxu3 }
 0x2a8   :  { %v236_v59 = vadd.f32 %v1396_v55, %v235_v58 }
 0x2aa   :  { %239 = vst.msk [vmem:[#allocation4 + $0x8] sm:$0xff] %vm64_vm0, %v236_v59  ;;  %1355 = vmatmul.msk.f32.gmra.mxu2 %vm64_vm0, %v236_v59 }
 0x31f   :  { %v269_v60 = vpop.f32.mrf.mxu2 }
 0x320   :  { %v1775_v3 = vadd.f32 %v1397_v62, %v269_v60 }
 0x322   :  { %v306_v4 = vadd.f32 %v299_v61, %v1775_v3 }
 0x324   :  { %v1356_v8 = vmul.f32 -1.442695, %v306_v4 }
 0x32d   :  { %v272_v0 = vpop.f32.mrf.mxu2 }
 0x32e   :  { %v1772_v1 = vadd.f32 %v1397_v62, %v272_v0 }
 0x330   :  { %v307_v2 = vadd.f32 %v303_v63, %v1772_v1 }
 0x332   :  { %1402 = vtanh.f32 %v307_v2  ;;  %v1357_v7 = vmul.f32 -1.442695, %v307_v2 }
 0x333   :  { %1404 = vtanh.f32 %v306_v4 }
 0x334   :  { %1406 = vpow2.f32 %v1357_v7 }
 0x335   :  { %1408 = vpow2.f32 %v1356_v8 }
 0x338   :  { %v1403_v5 = vpop.eup %1402 }
 0x339   :  { %354 = vrot.lane.b32.xlu2 %v1403_v5, %s1585_s9  ;;  %v1405_v6 = vpop.eup %1404 }
 0x33a   :  { %v1407_v9 = vpop.eup %1406 }
 0x33b   :  { %v315_v10 = vadd.f32 1.0, %v1407_v9  ;;  %v1409_v11 = vpop.eup %1408 }
 0x33c   :  { %v314_v12 = vadd.f32 1.0, %v1409_v11 }
 0x33d   :  { %1410 = vrcp.f32 %v315_v10  ;;  %v342_v21 = vand.u32 2147483648, %v315_v10  ;;  %vm336_vm4 = vweird.f32 %v315_v10  ;;  %v340_v22 = vand.u32 2147483647, %v315_v10 }
 0x33e   :  { %1412 = vrcp.f32 %v314_v12  ;;  %v327_v30 = vand.u32 2147483648, %v314_v12  ;;  %vm321_vm8 = vweird.f32 %v314_v12  ;;  %v325_v31 = vand.u32 2147483647, %v314_v12 }
 0x33f   :  { %v343_v25 = vor.u32 1.1754944e-38, %v342_v21  ;;  %vm341_vm6 = vcmp.eq.f32.partialorder %v340_v22, 8.507059e+37 }
 0x340   :  { %v328_v33 = vor.u32 1.1754944e-38, %v327_v30  ;;  %vm326_vm10 = vcmp.eq.f32.partialorder %v325_v31, 8.507059e+37 }
 0x341   :  { %352 = vrot.lane.b32.xlu2 %v1405_v6, %s1585_s9 }
 0x343   :  { %v1411_v13 = vpop.eup %1410 }
 0x344   :  { %v332_v14 = vmul.f32 %v1411_v13, %v315_v10  ;;  %v1413_v16 = vpop.eup %1412  ;;  %vm337_vm3 = vweird.f32 %v1411_v13 }
 0x345   :  { %v317_v18 = vmul.f32 %v1413_v16, %v314_v12  ;;  %vm338_vm5 = vmor %vm336_vm4, %vm337_vm3  ;;  %vm322_vm7 = vweird.f32 %v1413_v16 }
 0x346   :  { %v333_v15 = vsub.f32 1.0, %v332_v14  ;;  %vm323_vm9 = vmor %vm321_vm8, %vm322_vm7 }
 0x347   :  { %v318_v20 = vsub.f32 1.0, %v317_v18 }
 0x348   :  { %v334_v17 = vmul.f32 %v1411_v13, %v333_v15 }
 0x349   :  { %v319_v24 = vmul.f32 %v1413_v16, %v318_v20 }
 0x34a   :  { %v335_v19 = vadd.f32 %v1411_v13, %v334_v17 }
 0x34b   :  { %v320_v29 = vadd.f32 %v1413_v16, %v319_v24 }
 0x34c   :  { %v339_v23 = vsel %vm338_vm5, %v1411_v13, %v335_v19 }
 0x34d   :  { %v344_v27 = vsel %vm341_vm6, %v343_v25, %v339_v23  ;;  %v324_v32 = vsel %vm323_vm9, %v1413_v16, %v320_v29 }
 0x34e   :  { %v329_v34 = vsel %vm326_vm10, %v328_v33, %v324_v32  ;;  %v349_v37 = vmul.f32 0.0, %v344_v27 }
 0x34f   :  { %v348_v40 = vmul.f32 0.0, %v329_v34 }
 0x393   :  { %v355_v26 = vpop.permute.xlu2 %354 }
 0x394   :  { %v359_v28 = vmul.f32 %v355_v26, %v344_v27 }
 0x396   :  { %364 = vrot.lane.b32.xlu0 %v359_v28, %s1586_s12 }
 0x39b   :  { %v353_v35 = vpop.permute.xlu2 %352 }
 0x39c   :  { %v358_v36 = vmul.f32 %v353_v35, %v329_v34 }
 0x39e   :  { %362 = vrot.lane.b32.xlu1 %v358_v36, %s1586_s12 }
 0x408   :  { %v365_v38 = vpop.permute.xlu0 %364 }
 0x409   :  { %v1782_v39 = vadd.f32 %v365_v38, %v349_v37 }
 0x40b   :  { %1414 = vtanh.f32 %v1782_v39  ;;  %v469_v26 = vrot.slane %v1782_v39, 7 }
 0x410   :  { %v363_v41 = vpop.permute.xlu1 %362 }
 0x411   :  { %v1415_v42 = vpop.eup %1414  ;;  %v1785_v43 = vadd.f32 %v363_v41, %v348_v40 }
 0x412   :  { %376 = vrot.lane.b32.xlu2 %v1415_v42, %s1585_s9 }
 0x413   :  { %1416 = vtanh.f32 %v1785_v43  ;;  %v468_v28 = vrot.slane %v1785_v43, 7 }
 0x419   :  { %v1417_v44 = vpop.eup %1416 }
 0x41a   :  { %374 = vrot.lane.b32.xlu0 %v1417_v44, %s1585_s9 }
 0x46c   :  { %v377_v45 = vpop.permute.xlu2 %376 }
 0x46d   :  { %v1790_v46 = vmul.f32 %v377_v45, %v344_v27 }
 0x46f   :  { %v393_v48 = vrot.slane %v1790_v46, 7 }
 0x48c   :  { %v375_v47 = vpop.permute.xlu0 %374 }
 0x48d   :  { %v1793_v49 = vmul.f32 %v375_v47, %v329_v34 }
 0x48f   :  { %v395_v50 = vsel %vm394_vm11, %v393_v48, %v1793_v49 }
 0x490   :  { %396 = vrot.lane.b32.xlu1 %v395_v50, %s1586_s12 }
 0x502   :  { %v397_v51 = vpop.permute.xlu1 %396 }
 0x503   :  { %1358 = vmatmul.msk.f32.vlgmr.msrb.gmra.mxu1 %vm104_vm1, %v397_v51 }
 0x580   :  { %v417_v52 = vpop.f32.mrf.mxu1 }
 0x581   :  { %v421_v53 = vrot.slane %v417_v52, 7  ;;  %v425_v54 = vadd.f32 %v417_v52, %v1772_v1 }
 0x583   :  { %v424_v55 = vadd.f32 %v421_v53, %v1775_v3  ;;  %1418 = vtanh.f32 %v425_v54  ;;  %v1360_v61 = vmul.f32 -1.442695, %v425_v54 }
 0x585   :  { %1420 = vtanh.f32 %v424_v55  ;;  %v1359_v58 = vmul.f32 -1.442695, %v424_v55 }
 0x587   :  { %1422 = vpow2.f32 %v1359_v58 }
 0x589   :  { %v1419_v56 = vpop.eup %1418 }
 0x58a   :  { %478 = vrot.lane.b32.xlu0 %v1419_v56, %s1585_s9 }
 0x58b   :  { %v1421_v57 = vpop.eup %1420 }
 0x58c   :  { %476 = vrot.lane.b32.xlu2 %v1421_v57, %s1585_s9 }
 0x58d   :  { %v1423_v59 = vpop.eup %1422 }
 0x58e   :  { %v432_v60 = vadd.f32 1.0, %v1423_v59 }
 0x590   :  { %1424 = vrcp.f32 %v432_v60  ;;  %v445_v7 = vand.u32 2147483648, %v432_v60  ;;  %vm439_vm13 = vweird.f32 %v432_v60  ;;  %v443_v8 = vand.u32 2147483647, %v432_v60 }
 0x591   :  { %1426 = vpow2.f32 %v1360_v61 }
 0x592   :  { %v446_v10 = vor.u32 1.1754944e-38, %v445_v7  ;;  %vm444_vm15 = vcmp.eq.f32.partialorder %v443_v8, 8.507059e+37 }
 0x596   :  { %v1425_v62 = vpop.eup %1424 }
 0x597   :  { %v435_v63 = vmul.f32 %v1425_v62, %v432_v60  ;;  %v1427_v2 = vpop.eup %1426  ;;  %vm440_vm12 = vweird.f32 %v1425_v62 }
 0x598   :  { %v433_v4 = vadd.f32 1.0, %v1427_v2  ;;  %vm441_vm14 = vmor %vm439_vm13, %vm440_vm12 }
 0x599   :  { %v436_v0 = vsub.f32 1.0, %v435_v63 }
 0x59a   :  { %1428 = vrcp.f32 %v433_v4  ;;  %v460_v19 = vand.u32 2147483648, %v433_v4  ;;  %vm454_vm2 = vweird.f32 %v433_v4  ;;  %v458_v20 = vand.u32 2147483647, %v433_v4 }
 0x59b   :  { %v437_v5 = vmul.f32 %v1425_v62, %v436_v0 }
 0x59c   :  { %v461_v22 = vor.u32 1.1754944e-38, %v460_v19  ;;  %vm459_vm4 = vcmp.eq.f32.partialorder %v458_v20, 8.507059e+37 }
 0x59d   :  { %v438_v6 = vadd.f32 %v1425_v62, %v437_v5 }
 0x59f   :  { %v442_v9 = vsel %vm441_vm14, %v1425_v62, %v438_v6 }
 0x5a0   :  { %v1429_v11 = vpop.eup %1428  ;;  %v447_v13 = vsel %vm444_vm15, %v446_v10, %v442_v9 }
 0x5a1   :  { %v450_v15 = vmul.f32 %v1429_v11, %v433_v4  ;;  %vm455_vm0 = vweird.f32 %v1429_v11  ;;  %v472_v31 = vmul.f32 %v468_v28, %v447_v13 }
 0x5a2   :  { %vm456_vm3 = vmor %vm454_vm2, %vm455_vm0 }
 0x5a3   :  { %v451_v16 = vsub.f32 1.0, %v450_v15 }
 0x5a5   :  { %v452_v17 = vmul.f32 %v1429_v11, %v451_v16 }
 0x5a7   :  { %v453_v18 = vadd.f32 %v1429_v11, %v452_v17 }
 0x5a9   :  { %v457_v21 = vsel %vm456_vm3, %v1429_v11, %v453_v18 }
 0x5aa   :  { %v462_v24 = vsel %vm459_vm4, %v461_v22, %v457_v21 }
 0x5ab   :  { %v473_v27 = vmul.f32 %v469_v26, %v462_v24 }
 0x5e6   :  { %v477_v12 = vpop.permute.xlu2 %476 }
 0x5e7   :  { %v482_v14 = vmul.f32 %v477_v12, %v447_v13 }
 0x5e9   :  { %486 = vrot.lane.b32.xlu1 %v482_v14, %s1586_s12 }
 0x5fc   :  { %v479_v23 = vpop.permute.xlu0 %478 }
 0x5fd   :  { %v483_v25 = vmul.f32 %v479_v23, %v462_v24 }
 0x5ff   :  { %488 = vrot.lane.b32.xlu2 %v483_v25, %s1586_s12 }
 0x659   :  { %v489_v29 = vpop.permute.xlu2 %488 }
 0x65a   :  { %v1807_v30 = vadd.f32 %v489_v29, %v473_v27 }
 0x65b   :  { %v487_v32 = vpop.permute.xlu1 %486 }
 0x65c   :  { %1430 = vtanh.f32 %v1807_v30  ;;  %v1810_v33 = vadd.f32 %v487_v32, %v472_v31  ;;  %v593_v25 = vrot.slane %v1807_v30, 7 }
 0x65e   :  { %1432 = vtanh.f32 %v1810_v33  ;;  %v592_v20 = vrot.slane %v1810_v33, 7 }
 0x662   :  { %v1431_v34 = vpop.eup %1430 }
 0x663   :  { %500 = vrot.lane.b32.xlu1 %v1431_v34, %s1585_s9 }
 0x664   :  { %v1433_v35 = vpop.eup %1432 }
 0x665   :  { %498 = vrot.lane.b32.xlu0 %v1433_v35, %s1585_s9 }
 0x6d5   :  { %v501_v36 = vpop.permute.xlu1 %500 }
 0x6d6   :  { %v1817_v39 = vmul.f32 %v501_v36, %v462_v24 }
 0x6d7   :  { %v499_v37 = vpop.permute.xlu0 %498 }
 0x6d8   :  { %v1815_v38 = vmul.f32 %v499_v37, %v447_v13 }
 0x6da   :  { %v517_v40 = vrot.slane %v1815_v38, 1 }
 0x6dc   :  { %v518_v41 = vsel %vm394_vm11, %v1817_v39, %v517_v40 }
 0x6dd   :  { %519 = vrot.lane.b32.xlu2 %v518_v41, %s1586_s12 }
 0x737   :  { %v520_v42 = vpop.permute.xlu2 %519 }
 0x738   :  { %1361 = vmatmul.msk.f32.vlgmr.msra.gmra.mxu3 %vm104_vm1, %v520_v42 }
 0x7bb   :  { %v540_v43 = vpop.f32.mrf.mxu3 }
 0x7bc   :  { %v544_v44 = vrot.slane %v540_v43, 6  ;;  %v545_v45 = vrot.slane %v540_v43, 7 }
 0x7be   :  { %v548_v47 = vadd.f32 %v544_v44, %v1775_v3  ;;  %v549_v48 = vadd.f32 %v545_v45, %v1772_v1 }
 0x7c0   :  { %1434 = vtanh.f32 %v548_v47  ;;  %v1362_v52 = vmul.f32 -1.442695, %v548_v47  ;;  %v1363_v53 = vmul.f32 -1.442695, %v549_v48 }
 0x7c1   :  { %1436 = vtanh.f32 %v549_v48 }
 0x7c2   :  { %1438 = vpow2.f32 %v1362_v52 }
 0x7c3   :  { %1440 = vpow2.f32 %v1363_v53 }
 0x7c6   :  { %v1435_v50 = vpop.eup %1434 }
 0x7c7   :  { %v1437_v51 = vpop.eup %1436  ;;  %600 = vrot.lane.b32.xlu0 %v1435_v50, %s1585_s9 }
 0x7c8   :  { %602 = vrot.lane.b32.xlu1 %v1437_v51, %s1585_s9  ;;  %v1439_v54 = vpop.eup %1438 }
 0x7c9   :  { %v1441_v55 = vpop.eup %1440  ;;  %v556_v56 = vadd.f32 1.0, %v1439_v54 }
 0x7ca   :  { %v557_v57 = vadd.f32 1.0, %v1441_v55 }
 0x7cb   :  { %1442 = vrcp.f32 %v556_v56  ;;  %v569_v6 = vand.u32 2147483648, %v556_v56  ;;  %vm563_vm7 = vweird.f32 %v556_v56  ;;  %v567_v8 = vand.u32 2147483647, %v556_v56 }
 0x7cc   :  { %1444 = vrcp.f32 %v557_v57  ;;  %v584_v7 = vand.u32 2147483648, %v557_v57  ;;  %vm578_vm8 = vweird.f32 %v557_v57  ;;  %v582_v9 = vand.u32 2147483647, %v557_v57 }
 0x7cd   :  { %v570_v12 = vor.u32 1.1754944e-38, %v569_v6  ;;  %vm568_vm12 = vcmp.eq.f32.partialorder %v567_v8, 8.507059e+37 }
 0x7ce   :  { %v585_v13 = vor.u32 1.1754944e-38, %v584_v7  ;;  %vm583_vm13 = vcmp.eq.f32.partialorder %v582_v9, 8.507059e+37 }
 0x7d1   :  { %v1443_v58 = vpop.eup %1442 }
 0x7d2   :  { %v1445_v59 = vpop.eup %1444  ;;  %v559_v60 = vmul.f32 %v1443_v58, %v556_v56  ;;  %vm564_vm5 = vweird.f32 %v1443_v58 }
 0x7d3   :  { %v574_v61 = vmul.f32 %v1445_v59, %v557_v57  ;;  %vm579_vm6 = vweird.f32 %v1445_v59  ;;  %vm565_vm9 = vmor %vm563_vm7, %vm564_vm5 }
 0x7d4   :  { %v560_v62 = vsub.f32 1.0, %v559_v60  ;;  %vm580_vm10 = vmor %vm578_vm8, %vm579_vm6 }
 0x7d5   :  { %v575_v63 = vsub.f32 1.0, %v574_v61 }
 0x7d6   :  { %v561_v0 = vmul.f32 %v1443_v58, %v560_v62 }
 0x7d7   :  { %v576_v2 = vmul.f32 %v1445_v59, %v575_v63 }
 0x7d8   :  { %v562_v4 = vadd.f32 %v1443_v58, %v561_v0 }
 0x7d9   :  { %v577_v5 = vadd.f32 %v1445_v59, %v576_v2 }
 0x7da   :  { %v566_v10 = vsel %vm565_vm9, %v1443_v58, %v562_v4 }
 0x7db   :  { %v581_v11 = vsel %vm580_vm10, %v1445_v59, %v577_v5  ;;  %v571_v15 = vsel %vm568_vm12, %v570_v12, %v566_v10 }
 0x7dc   :  { %v586_v17 = vsel %vm583_vm13, %v585_v13, %v581_v11  ;;  %v596_v21 = vmul.f32 %v592_v20, %v571_v15 }
 0x7dd   :  { %v597_v26 = vmul.f32 %v593_v25, %v586_v17 }
 0x839   :  { %v601_v14 = vpop.permute.xlu0 %600 }
 0x83a   :  { %v603_v16 = vpop.permute.xlu1 %602  ;;  %v606_v18 = vmul.f32 %v601_v14, %v571_v15 }
 0x83b   :  { %v607_v19 = vmul.f32 %v603_v16, %v586_v17 }
 0x83c   :  { %610 = vrot.lane.b32.xlu2 %v606_v18, %s1586_s12 }
 0x83d   :  { %612 = vrot.lane.b32.xlu0 %v607_v19, %s1586_s12 }
 0x896   :  { %v611_v22 = vpop.permute.xlu2 %610 }
 0x897   :  { %v1831_v23 = vadd.f32 %v611_v22, %v596_v21 }
 0x899   :  { %1446 = vtanh.f32 %v1831_v23  ;;  %v717_v22 = vrot.slane %v1831_v23, 7 }
 0x89f   :  { %v1447_v24 = vpop.eup %1446 }
 0x8a0   :  { %622 = vrot.lane.b32.xlu1 %v1447_v24, %s1585_s9 }
 0x8af   :  { %v613_v27 = vpop.permute.xlu0 %612 }
 0x8b0   :  { %v1836_v28 = vadd.f32 %v613_v27, %v597_v26 }
 0x8b2   :  { %1448 = vtanh.f32 %v1836_v28 }
 0x8b8   :  { %v1449_v29 = vpop.eup %1448 }
 0x8b9   :  { %624 = vrot.lane.b32.xlu2 %v1449_v29, %s1585_s9 }
 0x912   :  { %v623_v31 = vpop.permute.xlu1 %622 }
 0x913   :  { %v625_v32 = vpop.permute.xlu2 %624  ;;  %v1840_v33 = vmul.f32 %v623_v31, %v571_v15 }
 0x914   :  { %v1842_v34 = vmul.f32 %v625_v32, %v586_v17  ;;  %v718_v17 = vrot.slane %v1836_v28, 7 }
 0x915   :  { %v641_v35 = vrot.slane %v1840_v33, 2 }
 0x916   :  { %v642_v36 = vrot.slane %v1842_v34, 1 }
 0x918   :  { %v643_v30 = vsel %vm394_vm11, %v642_v36, %v641_v35 }
 0x919   :  { %644 = vrot.lane.b32.xlu0 %v643_v30, %s1586_s12 }
 0x98b   :  { %v645_v37 = vpop.permute.xlu0 %644 }
 0x98c   :  { %1364 = vmatmul.msk.f32.vlgmr.msra.gmra.mxu0 %vm104_vm1, %v645_v37 }
 0xa09   :  { %v665_v40 = vpop.f32.mrf.mxu0 }
 0xa0a   :  { %v669_v41 = vrot.slane %v665_v40, 5  ;;  %v670_v42 = vrot.slane %v665_v40, 6 }
 0xa0c   :  { %v673_v43 = vadd.f32 %v669_v41, %v1775_v3  ;;  %v674_v44 = vadd.f32 %v670_v42, %v1772_v1 }
 0xa0e   :  { %1450 = vtanh.f32 %v673_v43  ;;  %v1366_v48 = vmul.f32 -1.442695, %v674_v44  ;;  %v1365_v53 = vmul.f32 -1.442695, %v673_v43 }
 0xa0f   :  { %1452 = vtanh.f32 %v674_v44 }
 0xa10   :  { %1454 = vpow2.f32 %v1366_v48 }
 0xa14   :  { %v1451_v45 = vpop.eup %1450 }
 0xa15   :  { %v1453_v47 = vpop.eup %1452  ;;  %725 = vrot.lane.b32.xlu1 %v1451_v45, %s1585_s9 }
 0xa16   :  { %727 = vrot.lane.b32.xlu2 %v1453_v47, %s1585_s9  ;;  %v1455_v50 = vpop.eup %1454 }
 0xa17   :  { %v682_v51 = vadd.f32 1.0, %v1455_v50 }
 0xa19   :  { %1456 = vrcp.f32 %v682_v51  ;;  %v709_v60 = vand.u32 2147483648, %v682_v51  ;;  %vm703_vm15 = vweird.f32 %v682_v51  ;;  %v707_v61 = vand.u32 2147483647, %v682_v51 }
 0xa1a   :  { %1458 = vpow2.f32 %v1365_v53 }
 0xa1b   :  { %v710_v63 = vor.u32 1.1754944e-38, %v709_v60  ;;  %vm708_vm2 = vcmp.eq.f32.partialorder %v707_v61, 8.507059e+37 }
 0xa1f   :  { %v1457_v52 = vpop.eup %1456 }
 0xa20   :  { %v699_v54 = vmul.f32 %v1457_v52, %v682_v51  ;;  %v1459_v56 = vpop.eup %1458  ;;  %vm704_vm14 = vweird.f32 %v1457_v52 }
 0xa21   :  { %v681_v58 = vadd.f32 1.0, %v1459_v56  ;;  %vm705_vm0 = vmor %vm703_vm15, %vm704_vm14 }
 0xa22   :  { %v700_v55 = vsub.f32 1.0, %v699_v54 }
 0xa23   :  { %1460 = vrcp.f32 %v681_v58  ;;  %v694_v10 = vand.u32 2147483648, %v681_v58  ;;  %vm688_vm4 = vweird.f32 %v681_v58  ;;  %v692_v11 = vand.u32 2147483647, %v681_v58 }
 0xa24   :  { %v701_v57 = vmul.f32 %v1457_v52, %v700_v55 }
 0xa25   :  { %v695_v13 = vor.u32 1.1754944e-38, %v694_v10  ;;  %vm693_vm6 = vcmp.eq.f32.partialorder %v692_v11, 8.507059e+37 }
 0xa26   :  { %v702_v59 = vadd.f32 %v1457_v52, %v701_v57 }
 0xa28   :  { %v706_v62 = vsel %vm705_vm0, %v1457_v52, %v702_v59 }
 0xa29   :  { %v711_v2 = vsel %vm708_vm2, %v710_v63, %v706_v62  ;;  %v1461_v4 = vpop.eup %1460 }
 0xa2a   :  { %v684_v6 = vmul.f32 %v1461_v4, %v681_v58  ;;  %vm689_vm3 = vweird.f32 %v1461_v4  ;;  %v722_v18 = vmul.f32 %v718_v17, %v711_v2 }
 0xa2b   :  { %vm690_vm5 = vmor %vm688_vm4, %vm689_vm3 }
 0xa2c   :  { %v685_v7 = vsub.f32 1.0, %v684_v6 }
 0xa2e   :  { %v686_v8 = vmul.f32 %v1461_v4, %v685_v7 }
 0xa30   :  { %v687_v9 = vadd.f32 %v1461_v4, %v686_v8 }
 0xa32   :  { %v691_v12 = vsel %vm690_vm5, %v1461_v4, %v687_v9 }
 0xa33   :  { %v696_v15 = vsel %vm693_vm6, %v695_v13, %v691_v12 }
 0xa34   :  { %v721_v24 = vmul.f32 %v717_v22, %v696_v15 }
 0xa70   :  { %v728_v0 = vpop.permute.xlu2 %727 }
 0xa71   :  { %v732_v5 = vmul.f32 %v728_v0, %v711_v2 }
 0xa73   :  { %737 = vrot.lane.b32.xlu1 %v732_v5, %s1586_s12 }
 0xa87   :  { %v726_v14 = vpop.permute.xlu1 %725 }
 0xa88   :  { %v731_v16 = vmul.f32 %v726_v14, %v696_v15 }
 0xa8a   :  { %735 = vrot.lane.b32.xlu0 %v731_v16, %s1586_s12 }
 0xae5   :  { %v738_v19 = vpop.permute.xlu1 %737 }
 0xae6   :  { %v1856_v20 = vadd.f32 %v738_v19, %v722_v18 }
 0xae8   :  { %1462 = vtanh.f32 %v1856_v20  ;;  %v843_v17 = vrot.slane %v1856_v20, 7 }
 0xaee   :  { %v1463_v21 = vpop.eup %1462 }
 0xaef   :  { %749 = vrot.lane.b32.xlu0 %v1463_v21, %s1585_s9 }
 0xafc   :  { %v736_v25 = vpop.permute.xlu0 %735 }
 0xafd   :  { %v1861_v26 = vadd.f32 %v736_v25, %v721_v24 }
 0xaff   :  { %1464 = vtanh.f32 %v1861_v26  ;;  %v842_v16 = vrot.slane %v1861_v26, 7 }
 0xb05   :  { %v1465_v27 = vpop.eup %1464 }
 0xb06   :  { %747 = vrot.lane.b32.xlu2 %v1465_v27, %s1585_s9 }
 0xb60   :  { %v748_v28 = vpop.permute.xlu2 %747 }
 0xb61   :  { %v750_v29 = vpop.permute.xlu0 %749  ;;  %v1865_v31 = vmul.f32 %v748_v28, %v696_v15 }
 0xb62   :  { %v1867_v32 = vmul.f32 %v750_v29, %v711_v2 }
 0xb63   :  { %v766_v35 = vrot.slane %v1865_v31, 3 }
 0xb64   :  { %v767_v36 = vrot.slane %v1867_v32, 2 }
 0xb66   :  { %v768_v23 = vsel %vm394_vm11, %v767_v36, %v766_v35 }
 0xb67   :  { %769 = vrot.lane.b32.xlu1 %v768_v23, %s1586_s12 }
 0xbd9   :  { %v770_v30 = vpop.permute.xlu1 %769 }
 0xbda   :  { %1367 = vmatmul.msk.f32.vlgmr.msra.gmra.mxu1 %vm104_vm1, %v770_v30 }
 0xc57   :  { %v790_v37 = vpop.f32.mrf.mxu1 }
 0xc58   :  { %v794_v40 = vrot.slane %v790_v37, 4  ;;  %v795_v41 = vrot.slane %v790_v37, 5 }
 0xc5a   :  { %v798_v42 = vadd.f32 %v794_v40, %v1775_v3  ;;  %v799_v43 = vadd.f32 %v795_v41, %v1772_v1 }
 0xc5c   :  { %1466 = vtanh.f32 %v798_v42  ;;  %v1368_v47 = vmul.f32 -1.442695, %v798_v42  ;;  %v1369_v52 = vmul.f32 -1.442695, %v799_v43 }
 0xc5d   :  { %1468 = vtanh.f32 %v799_v43 }
 0xc5e   :  { %1470 = vpow2.f32 %v1368_v47 }
 0xc62   :  { %v1467_v44 = vpop.eup %1466 }
 0xc63   :  { %v1469_v45 = vpop.eup %1468  ;;  %850 = vrot.lane.b32.xlu2 %v1467_v44, %s1585_s9 }
 0xc64   :  { %852 = vrot.lane.b32.xlu0 %v1469_v45, %s1585_s9  ;;  %v1471_v48 = vpop.eup %1470 }
 0xc65   :  { %v806_v50 = vadd.f32 1.0, %v1471_v48 }
 0xc67   :  { %1472 = vrcp.f32 %v806_v50  ;;  %v819_v59 = vand.u32 2147483648, %v806_v50  ;;  %vm813_vm8 = vweird.f32 %v806_v50  ;;  %v817_v60 = vand.u32 2147483647, %v806_v50 }
 0xc68   :  { %1474 = vpow2.f32 %v1369_v52 }
 0xc69   :  { %v820_v62 = vor.u32 1.1754944e-38, %v819_v59  ;;  %vm818_vm10 = vcmp.eq.f32.partialorder %v817_v60, 8.507059e+37 }
 0xc6d   :  { %v1473_v51 = vpop.eup %1472 }
 0xc6e   :  { %v809_v53 = vmul.f32 %v1473_v51, %v806_v50  ;;  %v1475_v56 = vpop.eup %1474  ;;  %vm814_vm7 = vweird.f32 %v1473_v51 }
 0xc6f   :  { %v807_v57 = vadd.f32 1.0, %v1475_v56  ;;  %vm815_vm9 = vmor %vm813_vm8, %vm814_vm7 }
 0xc70   :  { %v810_v54 = vsub.f32 1.0, %v809_v53 }
 0xc71   :  { %1476 = vrcp.f32 %v807_v57  ;;  %v834_v9 = vand.u32 2147483648, %v807_v57  ;;  %vm828_vm13 = vweird.f32 %v807_v57  ;;  %v832_v10 = vand.u32 2147483647, %v807_v57 }
 0xc72   :  { %v811_v55 = vmul.f32 %v1473_v51, %v810_v54 }
 0xc73   :  { %v835_v12 = vor.u32 1.1754944e-38, %v834_v9  ;;  %vm833_vm15 = vcmp.eq.f32.partialorder %v832_v10, 8.507059e+37 }
 0xc74   :  { %v812_v58 = vadd.f32 %v1473_v51, %v811_v55 }
 0xc76   :  { %v816_v61 = vsel %vm815_vm9, %v1473_v51, %v812_v58 }
 0xc77   :  { %v821_v0 = vsel %vm818_vm10, %v820_v62, %v816_v61  ;;  %v1477_v4 = vpop.eup %1476 }
 0xc78   :  { %v824_v5 = vmul.f32 %v1477_v4, %v807_v57  ;;  %vm829_vm12 = vweird.f32 %v1477_v4  ;;  %v846_v18 = vmul.f32 %v842_v16, %v821_v0 }
 0xc79   :  { %vm830_vm14 = vmor %vm828_vm13, %vm829_vm12 }
 0xc7a   :  { %v825_v6 = vsub.f32 1.0, %v824_v5 }
 0xc7c   :  { %v826_v7 = vmul.f32 %v1477_v4, %v825_v6 }
 0xc7e   :  { %v827_v8 = vadd.f32 %v1477_v4, %v826_v7 }
 0xc80   :  { %v831_v11 = vsel %vm830_vm14, %v1477_v4, %v827_v8 }
 0xc81   :  { %v836_v14 = vsel %vm833_vm15, %v835_v12, %v831_v11 }
 0xc82   :  { %v847_v19 = vmul.f32 %v843_v17, %v836_v14 }
 0xcbd   :  { %v851_v63 = vpop.permute.xlu2 %850 }
 0xcbe   :  { %v856_v2 = vmul.f32 %v851_v63, %v821_v0 }
 0xcc0   :  { %860 = vrot.lane.b32.xlu1 %v856_v2, %s1586_s12 }
 0xcd6   :  { %v853_v13 = vpop.permute.xlu0 %852 }
 0xcd7   :  { %v857_v15 = vmul.f32 %v853_v13, %v836_v14 }
 0xcd9   :  { %862 = vrot.lane.b32.xlu2 %v857_v15, %s1586_s12 }
 0xd32   :  { %v861_v21 = vpop.permute.xlu1 %860 }
 0xd33   :  { %v863_v22 = vpop.permute.xlu2 %862  ;;  %v1882_v24 = vadd.f32 %v861_v21, %v846_v18 }
 0xd34   :  { %v1884_v25 = vadd.f32 %v863_v22, %v847_v19 }
 0xd35   :  { %1478 = vtanh.f32 %v1882_v24  ;;  %v967_v17 = vrot.slane %v1882_v24, 7 }
 0xd36   :  { %1480 = vtanh.f32 %v1884_v25 }
 0xd3b   :  { %v1479_v27 = vpop.eup %1478 }
 0xd3c   :  { %v1481_v28 = vpop.eup %1480  ;;  %872 = vrot.lane.b32.xlu0 %v1479_v27, %s1585_s9  ;;  %v968_v27 = vrot.slane %v1884_v25, 7 }
 0xd3d   :  { %874 = vrot.lane.b32.xlu1 %v1481_v28, %s1585_s9 }
 0xdae   :  { %v873_v26 = vpop.permute.xlu0 %872 }
 0xdaf   :  { %v875_v20 = vpop.permute.xlu1 %874  ;;  %v1890_v29 = vmul.f32 %v873_v26, %v821_v0 }
 0xdb0   :  { %v1892_v35 = vmul.f32 %v875_v20, %v836_v14 }
 0xdb1   :  { %v891_v36 = vrot.slane %v1890_v29, 4 }
 0xdb2   :  { %v892_v23 = vrot.slane %v1892_v35, 3 }
 0xdb4   :  { %v893_v30 = vsel %vm394_vm11, %v892_v23, %v891_v36 }
 0xdb5   :  { %894 = vrot.lane.b32.xlu2 %v893_v30, %s1586_s12 }
 0xe0f   :  { %v895_v37 = vpop.permute.xlu2 %894 }
 0xe10   :  { %1370 = vmatmul.msk.f32.vlgmr.msrb.gmra.mxu3 %vm104_vm1, %v895_v37 }
 0xe93   :  { %v915_v40 = vpop.f32.mrf.mxu3 }
 0xe94   :  { %v919_v41 = vrot.slane %v915_v40, 3  ;;  %v920_v42 = vrot.slane %v915_v40, 4 }
 0xe96   :  { %v923_v43 = vadd.f32 %v919_v41, %v1775_v3  ;;  %v924_v44 = vadd.f32 %v920_v42, %v1772_v1 }
 0xe98   :  { %1482 = vtanh.f32 %v923_v43  ;;  %v1371_v48 = vmul.f32 -1.442695, %v923_v43  ;;  %v1372_v50 = vmul.f32 -1.442695, %v924_v44 }
 0xe99   :  { %1484 = vtanh.f32 %v924_v44 }
 0xe9a   :  { %1486 = vpow2.f32 %v1371_v48 }
 0xe9b   :  { %1488 = vpow2.f32 %v1372_v50 }
 0xe9e   :  { %v1483_v45 = vpop.eup %1482 }
 0xe9f   :  { %v1485_v47 = vpop.eup %1484  ;;  %975 = vrot.lane.b32.xlu0 %v1483_v45, %s1585_s9 }
 0xea0   :  { %977 = vrot.lane.b32.xlu1 %v1485_v47, %s1585_s9  ;;  %v1487_v51 = vpop.eup %1486 }
 0xea1   :  { %v1489_v52 = vpop.eup %1488  ;;  %v931_v53 = vadd.f32 1.0, %v1487_v51 }
 0xea2   :  { %v932_v54 = vadd.f32 1.0, %v1489_v52 }
 0xea3   :  { %1490 = vrcp.f32 %v931_v53  ;;  %v944_v2 = vand.u32 2147483648, %v931_v53  ;;  %vm938_vm3 = vweird.f32 %v931_v53  ;;  %v942_v5 = vand.u32 2147483647, %v931_v53 }
 0xea4   :  { %1492 = vrcp.f32 %v932_v54  ;;  %v959_v4 = vand.u32 2147483648, %v932_v54  ;;  %vm953_vm4 = vweird.f32 %v932_v54  ;;  %v957_v6 = vand.u32 2147483647, %v932_v54 }
 0xea5   :  { %v945_v9 = vor.u32 1.1754944e-38, %v944_v2  ;;  %vm943_vm7 = vcmp.eq.f32.partialorder %v942_v5, 8.507059e+37 }
 0xea6   :  { %v960_v10 = vor.u32 1.1754944e-38, %v959_v4  ;;  %vm958_vm8 = vcmp.eq.f32.partialorder %v957_v6, 8.507059e+37 }
 0xea9   :  { %v1491_v55 = vpop.eup %1490 }
 0xeaa   :  { %v1493_v56 = vpop.eup %1492  ;;  %v934_v57 = vmul.f32 %v1491_v55, %v931_v53  ;;  %vm939_vm0 = vweird.f32 %v1491_v55 }
 0xeab   :  { %v949_v58 = vmul.f32 %v1493_v56, %v932_v54  ;;  %vm954_vm2 = vweird.f32 %v1493_v56  ;;  %vm940_vm5 = vmor %vm938_vm3, %vm939_vm0 }
 0xeac   :  { %v935_v59 = vsub.f32 1.0, %v934_v57  ;;  %vm955_vm6 = vmor %vm953_vm4, %vm954_vm2 }
 0xead   :  { %v950_v60 = vsub.f32 1.0, %v949_v58 }
 0xeae   :  { %v936_v61 = vmul.f32 %v1491_v55, %v935_v59 }
 0xeaf   :  { %v951_v62 = vmul.f32 %v1493_v56, %v950_v60 }
 0xeb0   :  { %v937_v63 = vadd.f32 %v1491_v55, %v936_v61 }
 0xeb1   :  { %v952_v0 = vadd.f32 %v1493_v56, %v951_v62 }
 0xeb2   :  { %v941_v7 = vsel %vm940_vm5, %v1491_v55, %v937_v63 }
 0xeb3   :  { %v956_v8 = vsel %vm955_vm6, %v1493_v56, %v952_v0  ;;  %v946_v12 = vsel %vm943_vm7, %v945_v9, %v941_v7 }
 0xeb4   :  { %v961_v14 = vsel %vm958_vm8, %v960_v10, %v956_v8  ;;  %v971_v18 = vmul.f32 %v967_v17, %v946_v12 }
 0xeb5   :  { %v972_v28 = vmul.f32 %v968_v27, %v961_v14 }
 0xf11   :  { %v976_v11 = vpop.permute.xlu0 %975 }
 0xf12   :  { %v978_v13 = vpop.permute.xlu1 %977  ;;  %v981_v15 = vmul.f32 %v976_v11, %v946_v12 }
 0xf13   :  { %v982_v16 = vmul.f32 %v978_v13, %v961_v14 }
 0xf14   :  { %985 = vrot.lane.b32.xlu2 %v981_v15, %s1586_s12 }
 0xf15   :  { %987 = vrot.lane.b32.xlu0 %v982_v16, %s1586_s12 }
 0xf6e   :  { %v986_v19 = vpop.permute.xlu2 %985 }
 0xf6f   :  { %v1906_v21 = vadd.f32 %v986_v19, %v971_v18 }
 0xf71   :  { %1494 = vtanh.f32 %v1906_v21 }
 0xf77   :  { %v1495_v22 = vpop.eup %1494 }
 0xf78   :  { %997 = vrot.lane.b32.xlu1 %v1495_v22, %s1585_s9 }
 0xf87   :  { %v988_v26 = vpop.permute.xlu0 %987 }
 0xf88   :  { %v1911_v20 = vadd.f32 %v988_v26, %v972_v28 }
 0xf8a   :  { %1496 = vtanh.f32 %v1911_v20  ;;  %v1093_v22 = vrot.slane %v1911_v20, 7 }
 0xf90   :  { %v1497_v36 = vpop.eup %1496 }
 0xf91   :  { %999 = vrot.lane.b32.xlu2 %v1497_v36, %s1585_s9 }
 0xfea   :  { %v998_v24 = vpop.permute.xlu1 %997 }
 0xfeb   :  { %v1000_v23 = vpop.permute.xlu2 %999  ;;  %v1915_v30 = vmul.f32 %v998_v24, %v946_v12  ;;  %v1092_v24 = vrot.slane %v1906_v21, 7 }
 0xfec   :  { %v1917_v37 = vmul.f32 %v1000_v23, %v961_v14 }
 0xfed   :  { %v1016_v40 = vrot.slane %v1915_v30, 5 }
 0xfee   :  { %v1017_v41 = vrot.slane %v1917_v37, 4 }
 0xff0   :  { %v1018_v25 = vsel %vm394_vm11, %v1017_v41, %v1016_v40 }
 0xff1   :  { %1019 = vrot.lane.b32.xlu0 %v1018_v25, %s1586_s12 }
0x1063   :  { %v1020_v42 = vpop.permute.xlu0 %1019 }
0x1064   :  { %1373 = vmatmul.msk.f32.vlgmr.msra.gmra.mxu2 %vm104_vm1, %v1020_v42 }
0x10e7   :  { %v1040_v43 = vpop.f32.mrf.mxu2 }
0x10e8   :  { %v1044_v44 = vrot.slane %v1040_v43, 2  ;;  %v1045_v45 = vrot.slane %v1040_v43, 3 }
0x10ea   :  { %v1048_v47 = vadd.f32 %v1044_v44, %v1775_v3  ;;  %v1049_v48 = vadd.f32 %v1045_v45, %v1772_v1 }
0x10ec   :  { %1498 = vtanh.f32 %v1048_v47  ;;  %v1375_v52 = vmul.f32 -1.442695, %v1049_v48  ;;  %v1374_v56 = vmul.f32 -1.442695, %v1048_v47 }
0x10ed   :  { %1500 = vtanh.f32 %v1049_v48 }
0x10ee   :  { %1502 = vpow2.f32 %v1375_v52 }
0x10f2   :  { %v1499_v50 = vpop.eup %1498 }
0x10f3   :  { %v1501_v51 = vpop.eup %1500  ;;  %1100 = vrot.lane.b32.xlu1 %v1499_v50, %s1585_s9 }
0x10f4   :  { %1102 = vrot.lane.b32.xlu2 %v1501_v51, %s1585_s9  ;;  %v1503_v53 = vpop.eup %1502 }
0x10f5   :  { %v1057_v54 = vadd.f32 1.0, %v1503_v53 }
0x10f7   :  { %1504 = vrcp.f32 %v1057_v54  ;;  %v1084_v63 = vand.u32 2147483648, %v1057_v54  ;;  %vm1078_vm10 = vweird.f32 %v1057_v54  ;;  %v1082_v0 = vand.u32 2147483647, %v1057_v54 }
0x10f8   :  { %1506 = vpow2.f32 %v1374_v56 }
0x10f9   :  { %v1085_v4 = vor.u32 1.1754944e-38, %v1084_v63  ;;  %vm1083_vm13 = vcmp.eq.f32.partialorder %v1082_v0, 8.507059e+37 }
0x10fd   :  { %v1505_v55 = vpop.eup %1504 }
0x10fe   :  { %v1074_v57 = vmul.f32 %v1505_v55, %v1057_v54  ;;  %v1507_v59 = vpop.eup %1506  ;;  %vm1079_vm9 = vweird.f32 %v1505_v55 }
0x10ff   :  { %v1056_v61 = vadd.f32 1.0, %v1507_v59  ;;  %vm1080_vm12 = vmor %vm1078_vm10, %vm1079_vm9  ;;  %vm390_vm10 = vcmask 253952  }
0x1100   :  { %v1075_v58 = vsub.f32 1.0, %v1074_v57 }
0x1101   :  { %1508 = vrcp.f32 %v1056_v61  ;;  %v1069_v13 = vand.u32 2147483648, %v1056_v61  ;;  %vm1063_vm15 = vweird.f32 %v1056_v61  ;;  %v1067_v14 = vand.u32 2147483647, %v1056_v61 }
0x1102   :  { %v1076_v60 = vmul.f32 %v1505_v55, %v1075_v58 }
0x1103   :  { %v1070_v16 = vor.u32 1.1754944e-38, %v1069_v13  ;;  %vm1068_vm2 = vcmp.eq.f32.partialorder %v1067_v14, 8.507059e+37 }
0x1104   :  { %v1077_v62 = vadd.f32 %v1505_v55, %v1076_v60 }
0x1106   :  { %v1081_v2 = vsel %vm1080_vm12, %v1505_v55, %v1077_v62  ;;  %vm763_vm12 = vcmask 257027  }
0x1107   :  { %v1086_v6 = vsel %vm1083_vm13, %v1085_v4, %v1081_v2  ;;  %v1509_v7 = vpop.eup %1508  ;;  %vm1138_vm13 = vcmask 260102  }
0x1108   :  { %v1059_v9 = vmul.f32 %v1509_v7, %v1056_v61  ;;  %vm1064_vm14 = vweird.f32 %v1509_v7  ;;  %v1097_v27 = vmul.f32 %v1093_v22, %v1086_v6 }
0x1109   :  { %vm1065_vm0 = vmor %vm1063_vm15, %vm1064_vm14  ;;  %vm514_vm14 = vcmask 254977   ;;  %vm888_vm15 = vcmask 258052  }
0x110a   :  { %v1060_v10 = vsub.f32 1.0, %v1059_v9 }
0x110c   :  { %v1061_v11 = vmul.f32 %v1509_v7, %v1060_v10 }
0x110e   :  { %v1062_v12 = vadd.f32 %v1509_v7, %v1061_v11 }
0x1110   :  { %v1066_v15 = vsel %vm1065_vm0, %v1509_v7, %v1062_v12  ;;  %vm638_vm0 = vcmask 256002  }
0x1111   :  { %v1071_v18 = vsel %vm1068_vm2, %v1070_v16, %v1066_v15  ;;  %vm1013_vm2 = vcmask 259077  }
0x1112   :  { %v1096_v23 = vmul.f32 %v1092_v24, %v1071_v18 }
0x114e   :  { %v1103_v5 = vpop.permute.xlu2 %1102 }
0x114f   :  { %v1107_v8 = vmul.f32 %v1103_v5, %v1086_v6 }
0x1151   :  { %1112 = vrot.lane.b32.xlu1 %v1107_v8, %s1586_s12 }
0x1165   :  { %v1101_v17 = vpop.permute.xlu1 %1100 }
0x1166   :  { %v1106_v19 = vmul.f32 %v1101_v17, %v1071_v18 }
0x1168   :  { %1110 = vrot.lane.b32.xlu0 %v1106_v19, %s1586_s12 }
0x11c3   :  { %v1113_v28 = vpop.permute.xlu1 %1112 }
0x11c4   :  { %v1931_v26 = vadd.f32 %v1113_v28, %v1097_v27 }
0x11c6   :  { %1510 = vtanh.f32 %v1931_v26  ;;  %v1218_v24 = vrot.slane %v1931_v26, 7 }
0x11cc   :  { %v1511_v36 = vpop.eup %1510 }
0x11cd   :  { %1124 = vrot.lane.b32.xlu0 %v1511_v36, %s1585_s9 }
0x11da   :  { %v1111_v40 = vpop.permute.xlu0 %1110 }
0x11db   :  { %v1936_v41 = vadd.f32 %v1111_v40, %v1096_v23 }
0x11dd   :  { %1512 = vtanh.f32 %v1936_v41  ;;  %v1217_v36 = vrot.slane %v1936_v41, 7 }
0x11e3   :  { %v1513_v25 = vpop.eup %1512 }
0x11e4   :  { %1122 = vrot.lane.b32.xlu2 %v1513_v25, %s1585_s9 }
0x123e   :  { %v1123_v20 = vpop.permute.xlu2 %1122 }
0x123f   :  { %v1125_v42 = vpop.permute.xlu0 %1124  ;;  %v1940_v43 = vmul.f32 %v1123_v20, %v1071_v18 }
0x1240   :  { %v1942_v44 = vmul.f32 %v1125_v42, %v1086_v6 }
0x1241   :  { %v1141_v45 = vrot.slane %v1940_v43, 6 }
0x1242   :  { %v1142_v47 = vrot.slane %v1942_v44, 5 }
0x1244   :  { %v1143_v21 = vsel %vm394_vm11, %v1142_v47, %v1141_v45 }
0x1245   :  { %1144 = vrot.lane.b32.xlu1 %v1143_v21, %s1586_s12 }
0x12b7   :  { %v1145_v48 = vpop.permute.xlu1 %1144 }
0x12b8   :  { %1376 = vmatmul.msk.f32.vlgmr.msrb.gmra.mxu0 %vm104_vm1, %v1145_v48 }
0x1335   :  { %v1165_v50 = vpop.f32.mrf.mxu0 }
0x1336   :  { %v1169_v51 = vrot.slane %v1165_v50, 1  ;;  %v1170_v52 = vrot.slane %v1165_v50, 2 }
0x1338   :  { %v1173_v53 = vadd.f32 %v1169_v51, %v1775_v3  ;;  %v1174_v54 = vadd.f32 %v1170_v52, %v1772_v1  ;;  %v1270_v51 = vld [vmem:[%s2050_s13 + $0x10] sm:$0xff]  ;;  %v1269_v52 = vld [vmem:[%s2050_s13 + $0x8] sm:$0xff] }
0x133a   :  { %1514 = vtanh.f32 %v1173_v53  ;;  %v1377_v57 = vmul.f32 -1.442695, %v1173_v53  ;;  %v1378_v61 = vmul.f32 -1.442695, %v1174_v54  ;;  %v1268_v53 = vld [vmem:[%s2050_s13] sm:$0xff] }
0x133b   :  { %1516 = vtanh.f32 %v1174_v54 }
0x133c   :  { %1518 = vpow2.f32 %v1377_v57 }
0x1340   :  { %v1515_v55 = vpop.eup %1514 }
0x1341   :  { %v1517_v56 = vpop.eup %1516  ;;  %1225 = vrot.lane.b32.xlu2 %v1515_v55, %s1585_s9 }
0x1342   :  { %1227 = vrot.lane.b32.xlu0 %v1517_v56, %s1585_s9  ;;  %v1519_v58 = vpop.eup %1518 }
0x1343   :  { %v1181_v59 = vadd.f32 1.0, %v1519_v58 }
0x1345   :  { %1520 = vrcp.f32 %v1181_v59  ;;  %v1194_v4 = vand.u32 2147483648, %v1181_v59  ;;  %vm1188_vm3 = vweird.f32 %v1181_v59  ;;  %v1192_v5 = vand.u32 2147483647, %v1181_v59 }
0x1346   :  { %1522 = vpow2.f32 %v1378_v61 }
0x1347   :  { %v1195_v7 = vor.u32 1.1754944e-38, %v1194_v4  ;;  %vm1193_vm5 = vcmp.eq.f32.partialorder %v1192_v5, 8.507059e+37 }
0x134b   :  { %v1521_v60 = vpop.eup %1520 }
0x134c   :  { %v1184_v62 = vmul.f32 %v1521_v60, %v1181_v59  ;;  %v1523_v1 = vpop.eup %1522  ;;  %vm1189_vm11 = vweird.f32 %v1521_v60  ;;  %v1273_v59 = vstv %s2051_s14 }
0x134d   :  { %v1182_v0 = vadd.f32 1.0, %v1523_v1  ;;  %vm1190_vm4 = vmor %vm1188_vm3, %vm1189_vm11  ;;  %vm1263_vm11 = vcmask 261127  }
0x134e   :  { %v1185_v3 = vsub.f32 1.0, %v1184_v62 }
0x134f   :  { %1524 = vrcp.f32 %v1182_v0  ;;  %v1209_v16 = vand.u32 2147483648, %v1182_v0  ;;  %vm1203_vm7 = vweird.f32 %v1182_v0  ;;  %v1207_v17 = vand.u32 2147483647, %v1182_v0 }
0x1350   :  { %v1186_v63 = vmul.f32 %v1521_v60, %v1185_v3 }
0x1351   :  { %v1210_v19 = vor.u32 1.1754944e-38, %v1209_v16  ;;  %vm1208_vm9 = vcmp.eq.f32.partialorder %v1207_v17, 8.507059e+37 }
0x1352   :  { %v1187_v2 = vadd.f32 %v1521_v60, %v1186_v63 }
0x1354   :  { %v1191_v6 = vsel %vm1190_vm4, %v1521_v60, %v1187_v2 }
0x1355   :  { %v1953_v9 = vsel %vm1193_vm5, %v1195_v7, %v1191_v6  ;;  %v1525_v11 = vpop.eup %1524 }
0x1356   :  { %v1199_v12 = vmul.f32 %v1525_v11, %v1182_v0  ;;  %vm1204_vm6 = vweird.f32 %v1525_v11  ;;  %v1221_v23 = vmul.f32 %v1217_v36, %v1953_v9 }
0x1357   :  { %vm1205_vm8 = vmor %vm1203_vm7, %vm1204_vm6 }
0x1358   :  { %v1200_v13 = vsub.f32 1.0, %v1199_v12 }
0x135a   :  { %v1201_v14 = vmul.f32 %v1525_v11, %v1200_v13 }
0x135c   :  { %v1202_v15 = vadd.f32 %v1525_v11, %v1201_v14 }
0x135e   :  { %v1206_v18 = vsel %vm1205_vm8, %v1525_v11, %v1202_v15 }
0x135f   :  { %v1211_v27 = vsel %vm1208_vm9, %v1210_v19, %v1206_v18 }
0x1360   :  { %v1222_v40 = vmul.f32 %v1218_v24, %v1211_v27 }
0x139b   :  { %v1226_v8 = vpop.permute.xlu2 %1225 }
0x139c   :  { %v1231_v10 = vmul.f32 %v1226_v8, %v1953_v9 }
0x139e   :  { %1235 = vrot.lane.b32.xlu1 %v1231_v10, %s1586_s12 }
0x13b4   :  { %v1228_v22 = vpop.permute.xlu0 %1227 }
0x13b5   :  { %v1232_v28 = vmul.f32 %v1228_v22, %v1211_v27 }
0x13b7   :  { %1237 = vrot.lane.b32.xlu2 %v1232_v28, %s1586_s12 }
0x13bf   :  { %384 = vrot.lane.b32.xlu2 %v1793_v49, %s1586_s12 }
0x13c7   :  { %757 = vrot.lane.b32.xlu2 %v1865_v31, %s1586_s12 }
0x13cf   :  { %1132 = vrot.lane.b32.xlu2 %v1940_v43, %s1586_s12 }
0x13d7   :  { %510 = vrot.lane.b32.xlu2 %v1817_v39, %s1586_s12 }
0x13df   :  { %884 = vrot.lane.b32.xlu2 %v1892_v35, %s1586_s12 }
0x1410   :  { %v1236_v49 = vpop.permute.xlu1 %1235 }
0x1411   :  { %v1238_v25 = vpop.permute.xlu2 %1237  ;;  %v1241_v20 = vadd.f32 %v1236_v49, %v1221_v23 }
0x1412   :  { %v1242_v31 = vadd.f32 %v1238_v25, %v1222_v40 }
0x1413   :  { %1526 = vtanh.f32 %v1241_v20 }
0x1414   :  { %1528 = vtanh.f32 %v1242_v31 }
0x1419   :  { %v1527_v42 = vpop.eup %1526  ;;  %v385_v43 = vpop.permute.xlu2 %384 }
0x141a   :  { %v1529_v39 = vpop.eup %1528  ;;  %391 = vst.msk [vmem:[#allocation2] sm:$0x1] %vm390_vm10, %v385_v43  ;;  %1247 = vrot.lane.b32.xlu0 %v1527_v42, %s1585_s9 }
0x141b   :  { %1249 = vrot.lane.b32.xlu1 %v1529_v39, %s1585_s9 }
0x1421   :  { %v758_v35 = vpop.permute.xlu2 %757 }
0x1422   :  { %764 = vst.msk [vmem:[#allocation2] sm:$0x8] %vm763_vm12, %v758_v35  ;;  %508 = vrot.lane.b32.xlu0 %v1815_v38, %s1586_s12 }
0x1423   :  { %632 = vrot.lane.b32.xlu1 %v1840_v33, %s1586_s12 }
0x1429   :  { %v1133_v26 = vpop.permute.xlu2 %1132 }
0x142a   :  { %1139 = vst.msk [vmem:[#allocation2] sm:$0x40] %vm1138_vm13, %v1133_v26  ;;  %882 = vrot.lane.b32.xlu0 %v1890_v29, %s1586_s12 }
0x142b   :  { %1007 = vrot.lane.b32.xlu1 %v1915_v30, %s1586_s12 }
0x1431   :  { %v511_v41 = vpop.permute.xlu2 %510 }
0x1432   :  { %516 = vst.msk [vmem:[#allocation2 + $0x8] sm:$0x2] %vm514_vm14, %v511_v41  ;;  %634 = vrot.lane.b32.xlu0 %v1842_v34, %s1586_s12 }
0x1433   :  { %386 = vrot.lane.b32.xlu1 %v1790_v46, %s1586_s12 }
0x1439   :  { %v885_v38 = vpop.permute.xlu2 %884 }
0x143a   :  { %890 = vst.msk [vmem:[#allocation2 + $0x8] sm:$0x10] %vm888_vm15, %v885_v38 }
0x143b   :  { %759 = vrot.lane.b32.xlu1 %v1867_v32, %s1586_s12 }
0x1443   :  { %1134 = vrot.lane.b32.xlu1 %v1942_v44, %s1586_s12 }
0x148c   :  { %v1248_v33 = vpop.permute.xlu0 %1247 }
0x148d   :  { %v1250_v29 = vpop.permute.xlu1 %1249  ;;  %v1253_v30 = vmul.f32 %v1248_v33, %v1953_v9 }
0x148e   :  { %v1254_v45 = vmul.f32 %v1250_v29, %v1211_v27 }
0x148f   :  { %1257 = vrot.lane.b32.xlu0 %v1253_v30, %s1586_s12 }
0x1490   :  { %1259 = vrot.lane.b32.xlu2 %v1254_v45, %s1586_s12 }
0x1494   :  { %v509_v46 = vpop.permute.xlu0 %508 }
0x1495   :  { %v633_v34 = vpop.permute.xlu1 %632  ;;  %515 = vst.msk [vmem:[#allocation2] sm:$0x2] %vm514_vm14, %v509_v46 }
0x1496   :  { %639 = vst.msk [vmem:[#allocation2] sm:$0x4] %vm638_vm0, %v633_v34 }
0x1497   :  { %1009 = vrot.lane.b32.xlu0 %v1917_v37, %s1586_s12  ;;  %v1271_v37 = vld [vmem:[%s2050_s13 + $0x18] sm:$0xff]  ;;  %s1312_s13 = sshll.u32 %s2052_s15, 4  ;;  %s1313_s13 = int_to_ptr.hbm [resolvable:$true] %s1312_s13 }
0x1498   :  { %1292 = vmatpush.msrb.mxu1 %v1271_v37  ;;  %1318 = dma.vmem_to_hbm [thread:$0]  %s1311_s8, 256, %s1313_s13, [#allocation5], %s1589_s19, %s1589_s19, %s1582_s28  }
0x149a   :  { %1293 = vmatpush.msrb.mxu1 %v1270_v51 }
0x149c   :  { %v883_v32 = vpop.permute.xlu0 %882  ;;  %1294 = vmatpush.msrb.mxu1 %v1269_v52 }
0x149d   :  { %v1008_v44 = vpop.permute.xlu1 %1007  ;;  %889 = vst.msk [vmem:[#allocation2] sm:$0x10] %vm888_vm15, %v883_v32 }
0x149e   :  { %1014 = vst.msk [vmem:[#allocation2] sm:$0x20] %vm1013_vm2, %v1008_v44  ;;  %1295 = vmatpush.msrb.mxu1 %v1268_v53 }
0x14a4   :  { %v635_v47 = vpop.permute.xlu0 %634 }
0x14a5   :  { %v387_v21 = vpop.permute.xlu1 %386  ;;  %640 = vst.msk [vmem:[#allocation2 + $0x8] sm:$0x4] %vm638_vm0, %v635_v47 }
0x14a6   :  { %392 = vst.msk [vmem:[#allocation2 + $0x8] sm:$0x1] %vm390_vm10, %v387_v21 }
0x14ad   :  { %v760_v48 = vpop.permute.xlu1 %759 }
0x14ae   :  { %765 = vst.msk [vmem:[#allocation2 + $0x8] sm:$0x8] %vm763_vm12, %v760_v48 }
0x14b5   :  { %v1135_v50 = vpop.permute.xlu1 %1134 }
0x14b6   :  { %1140 = vst.msk [vmem:[#allocation2 + $0x8] sm:$0x40] %vm1138_vm13, %v1135_v50 }
0x14ea   :  { %v1260_v54 = vpop.permute.xlu2 %1259 }
0x14eb   :  { %1265 = vst.msk [vmem:[#allocation2 + $0x8] sm:$0x80] %vm1263_vm11, %v1260_v54 }
0x1501   :  { %v1258_v55 = vpop.permute.xlu0 %1257 }
0x1502   :  { %1264 = vst.msk [vmem:[#allocation2] sm:$0x80] %vm1263_vm11, %v1258_v55 }
0x1509   :  { %v1010_v56 = vpop.permute.xlu0 %1009  ;;  %v1266_v57 = vld [vmem:[#allocation2] sm:$0xff] }
0x150a   :  { %1015 = vst.msk [vmem:[#allocation2 + $0x8] sm:$0x20] %vm1013_vm2, %v1010_v56  ;;  %1379 = vmatmul.msk.f32.vlgmr.msrb.gmra.mxu1 %vm104_vm1, %v1266_v57 }
0x1511   :  { %v1267_v58 = vld [vmem:[#allocation2 + $0x8] sm:$0xff] }
0x1512   :  { %1380 = vmatmul.msk.f32.gmra.mxu1 %vm104_vm1, %v1267_v58  ;;  %vm1303_vm1 = vcmask 7168  }
0x1587   :  { %v1297_v60 = vpop.f32.mrf.mxu1 }
0x1588   :  { %v1298_v61 = vadd.f32 %v1297_v60, %v1273_v59 }
0x158a   :  { %1304 = vst.msk [vmem:[%s2054_s17] sm:$0xff] %vm1303_vm1, %v1298_v61 }
0x158f   :  { %v1300_v62 = vpop.f32.mrf.mxu1 }
0x1590   :  { %v1301_v3 = vadd.f32 %v1300_v62, %v1273_v59 }
0x1592   :  { %1305 = vst.msk [vmem:[%s2054_s17 + $0x8] sm:$0xff] %vm1303_vm1, %v1301_v3 }
0x1593   :  { %1578 = dma.done.wait [#allocation5], 256  }
0x1594   :  { %1579 = vsyncadd [#allocation5], 4294967040 }
0x1595   :  { %1580 = dma.done.wait [#allocation7], 256  }
0x1596   :  { %1581 = vsyncadd [#allocation7], 4294967040 }
0x1597   :  { %1344 = vsyncpa [#allocation5], 1 }
0x1598   :  { %1345 = vsyncpa [#allocation7], 1 }

</bundles_post_ra>
